<compile_context>
chip_gen: v5e
topology: v5e:2x2
jax: 0.10.0
libtpu: 0.0.40
codegen_flags: <defaults>
</compile_context>

<pallas_src>
import jax
import jax.numpy as jnp
from jax.experimental import pallas as pl
from jax.experimental.pallas import tpu as pltpu


def _round_up(n, m):
    return ((n + m - 1) // m) * m


def _lstm_controller_kernel(xr_ref, wih_ref, whh_ref, b_ref, fcw_ref, fcb_ref,
                            w_out_ref, hn_ref, cn_ref, gx_sc):
    Bp, H = hn_ref.shape
    T = xr_ref.shape[0] // Bp

    # One-shot input projection for all timesteps: (T*Bp, Dp) @ (Dp, 4H) + bias.
    gx_sc[...] = (jnp.dot(xr_ref[...], wih_ref[...],
                          preferred_element_type=jnp.float32) + b_ref[...])

    def step(t, carry):
        h, c = carry
        row = pl.multiple_of(t * Bp, Bp)                    # aligned sublane offset
        g = (gx_sc[pl.ds(row, Bp), :]
             + jnp.dot(h, whh_ref[...], preferred_element_type=jnp.float32))
        if_g = jax.nn.sigmoid(g[:, 0:2 * H])                # i|f: one 128-lane EUP pass
        i_g = if_g[:, 0:H]
        f_g = if_g[:, H:2 * H]
        g_g = jnp.tanh(g[:, 2 * H:3 * H])
        o_g = jax.nn.sigmoid(g[:, 3 * H:4 * H])
        c = f_g * c + i_g * g_g
        h = o_g * jnp.tanh(c)
        return (h, c)

    h0 = jnp.zeros((Bp, H), jnp.float32)
    c0 = jnp.zeros((Bp, H), jnp.float32)
    h, c = jax.lax.fori_loop(0, T, step, (h0, c0), unroll=True)

    # fc + softmax epilogue (one-time; the 3-lane output store is accepted).
    logits = (jnp.dot(h, fcw_ref[...], preferred_element_type=jnp.float32)
              + fcb_ref[...])
    m = jnp.max(logits, axis=-1, keepdims=True)
    e = jnp.exp(logits - m)
    w_out_ref[...] = e / jnp.sum(e, axis=-1, keepdims=True)
    hn_ref[...] = h
    cn_ref[...] = c


def prepare_lstm_params(w_ih, w_hh, b_ih, b_hh, fc_w, fc_b):
    """One-time weight re-layout, hoisted out of the per-call forward path."""
    D = w_ih.shape[1]
    Dp = _round_up(D, 8)
    wih_p = jnp.pad(jnp.transpose(w_ih).astype(jnp.float32),
                    ((0, Dp - D), (0, 0)))                   # (Dp, 4H)
    whh_p = jnp.transpose(w_hh).astype(jnp.float32)          # (H, 4H)
    bias_p = (b_ih + b_hh).astype(jnp.float32)[None, :]      # (1, 4H)
    fcw_p = jnp.transpose(fc_w).astype(jnp.float32)          # (H, C)
    fcb_p = fc_b.astype(jnp.float32)[None, :]                # (1, C)
    return (wih_p, whh_p, bias_p, fcw_p, fcb_p)


@jax.jit
def lstm_controller_forward(x, params):
    """x: (B, T, D) f32.  Returns (weights (B,3), (h_n (1,B,H), c_n (1,B,H)))."""
    wih_p, whh_p, bias_p, fcw_p, fcb_p = params
    B, T, D = x.shape
    Dp, H4 = wih_p.shape
    H = H4 // 4
    C = fcw_p.shape[1]
    Bp = _round_up(B, 8)

    # Activations: (B,T,D) -> time-major, batch padded to Bp, D padded to Dp.
    xt = jnp.transpose(x, (1, 0, 2))
    xt = jnp.pad(xt, ((0, 0), (0, Bp - B), (0, Dp - D)))
    xr = xt.reshape(T * Bp, Dp).astype(jnp.float32)

    out_shapes = (
        jax.ShapeDtypeStruct((Bp, C), jnp.float32),          # softmax weights (padded batch)
        jax.ShapeDtypeStruct((Bp, H), jnp.float32),          # h_T
        jax.ShapeDtypeStruct((Bp, H), jnp.float32),          # c_T
    )
    vmem = lambda: pl.BlockSpec(memory_space=pltpu.MemorySpace.VMEM)

    weights_p, hn_p, cn_p = pl.pallas_call(
        _lstm_controller_kernel,
        out_shape=out_shapes,
        in_specs=[vmem() for _ in range(6)],
        out_specs=(vmem(), vmem(), vmem()),
        scratch_shapes=[pltpu.VMEM((T * Bp, H4), jnp.float32)],   # precomputed x-gates
    )(xr, wih_p, whh_p, bias_p, fcw_p, fcb_p)

    weights = weights_p[:B, :]
    h_n = hn_p[:B, :][None]                                  # (1, B, H)
    c_n = cn_p[:B, :][None]
    return weights, (h_n, c_n)


def _reference_forward(x, w_ih, w_hh, b_ih, b_hh, fc_w, fc_b):
    """Pure-JAX reference matching torch.nn.LSTM(batch_first) + Linear + Softmax."""
    B, T, D = x.shape
    H = w_hh.shape[1]
    h = jnp.zeros((B, H), jnp.float32)
    c = jnp.zeros((B, H), jnp.float32)

    def step(carry, x_t):
        h, c = carry
        gates = x_t @ w_ih.T + h @ w_hh.T + b_ih + b_hh
        i = jax.nn.sigmoid(gates[:, 0 * H:1 * H])
        f = jax.nn.sigmoid(gates[:, 1 * H:2 * H])
        g = jnp.tanh(gates[:, 2 * H:3 * H])
        o = jax.nn.sigmoid(gates[:, 3 * H:4 * H])
        c = f * c + i * g
        h = o * jnp.tanh(c)
        return (h, c), None

    (h, c), _ = jax.lax.scan(step, (h, c), jnp.transpose(x, (1, 0, 2)))
    logits = h @ fc_w.T + fc_b
    weights = jax.nn.softmax(logits, axis=-1)
    return weights, (h[None], c[None])


def _init_params(key, input_size, hidden_size):
    """Deterministic init matching PyTorch shapes (uniform +-1/sqrt(H))."""
    k = jax.random.split(key, 6)
    s = 1.0 / jnp.sqrt(jnp.float32(hidden_size))
    u = lambda kk, shape: jax.random.uniform(kk, shape, jnp.float32, -s, s)
    w_ih = u(k[0], (4 * hidden_size, input_size))
    w_hh = u(k[1], (4 * hidden_size, hidden_size))
    b_ih = u(k[2], (4 * hidden_size,))
    b_hh = u(k[3], (4 * hidden_size,))
    fc_w = u(k[4], (3, hidden_size))
    fc_b = u(k[5], (3,))
    return w_ih, w_hh, b_ih, b_hh, fc_w, fc_b


if __name__ == "__main__":
    B, T, D, H = 2, 8, 28, 64          # batch, seq, input_size, hidden_size

    key = jax.random.PRNGKey(0)
    kx, kp = jax.random.split(key)
    x = jax.random.normal(kx, (B, T, D), jnp.float32)
    raw_params = _init_params(kp, D, H)
    params = prepare_lstm_params(*raw_params)     # one-time weight re-layout

    weights, (h_n, c_n) = lstm_controller_forward(x, params)
    jax.block_until_ready((weights, h_n, c_n))

    # Correctness check against the pure-JAX reference.  Tolerance accommodates
    # default MXU (bf16-based) f32 matmul precision on either side; genuine
    # layout / gate-order bugs produce errors orders of magnitude larger.
    rw, (rh, rc) = _reference_forward(x, *raw_params)
    assert weights.shape == (B, 3) and h_n.shape == (1, B, H) and c_n.shape == (1, B, H)
    assert bool(jnp.all(jnp.isfinite(weights))), "non-finite softmax weights"
    assert jnp.allclose(weights, rw, atol=5e-3), "softmax weights mismatch"
    assert jnp.allclose(h_n, rh, atol=5e-3), "h_n mismatch"
    assert jnp.allclose(c_n, rc, atol=5e-3), "c_n mismatch"

    print("KERNEL_OK")
</pallas_src>

<mosaic_0001>
module attributes {stable_mosaic.version = 11 : i64} {
  func.func @_lstm_controller_kernel(%arg0: memref<64x32xf32, #tpu.memory_space<vmem>>, %arg1: memref<32x256xf32, #tpu.memory_space<vmem>>, %arg2: memref<64x256xf32, #tpu.memory_space<vmem>>, %arg3: memref<1x256xf32, #tpu.memory_space<vmem>>, %arg4: memref<64x3xf32, #tpu.memory_space<vmem>>, %arg5: memref<1x3xf32, #tpu.memory_space<vmem>>, %arg6: memref<8x3xf32, #tpu.memory_space<vmem>>, %arg7: memref<8x64xf32, #tpu.memory_space<vmem>>, %arg8: memref<8x64xf32, #tpu.memory_space<vmem>>, %arg9: memref<64x256xf32, #tpu.memory_space<vmem>>) attributes {dimension_semantics = [], scalar_prefetch = 0 : i64, scratch_operands = 1 : i64, tpu.core_type = #tpu.core_type<tc>} {
    %c0 = arith.constant 0 : index
    %c0_0 = arith.constant 0 : index
    %0 = vector.load %arg0[%c0, %c0_0] : memref<64x32xf32, #tpu.memory_space<vmem>>, vector<64x32xf32>
    %c0_1 = arith.constant 0 : index
    %c0_2 = arith.constant 0 : index
    %1 = vector.load %arg1[%c0_1, %c0_2] : memref<32x256xf32, #tpu.memory_space<vmem>>, vector<32x256xf32>
    %cst = arith.constant dense<0.000000e+00> : vector<64x256xf32>
    %2 = tpu.matmul %0, %1, %cst {dimension_numbers = #tpu.dot_dimension_numbers<[1], [0], [0], [1], [0, 0, 1, 1], [], []>} : vector<64x32xf32>, vector<32x256xf32>, vector<64x256xf32> -> vector<64x256xf32>
    %c0_3 = arith.constant 0 : index
    %c0_4 = arith.constant 0 : index
    %3 = vector.load %arg3[%c0_3, %c0_4] : memref<1x256xf32, #tpu.memory_space<vmem>>, vector<1x256xf32>
    %4 = vector.broadcast %3 : vector<1x256xf32> to vector<64x256xf32>
    %5 = arith.addf %2, %4 : vector<64x256xf32>
    %c0_5 = arith.constant 0 : index
    %c0_6 = arith.constant 0 : index
    %6 = vector.load %arg9[%c0_5, %c0_6] : memref<64x256xf32, #tpu.memory_space<vmem>>, vector<64x256xf32>
    tpu.vector_store %arg9[%c0_5, %c0_6], %5 {strides = array<i32>} : memref<64x256xf32, #tpu.memory_space<vmem>>, vector<64x256xf32>,
    %cst_7 = arith.constant 0.000000e+00 : f32
    %7 = vector.broadcast %cst_7 : f32 to vector<8x64xf32>
    %cst_8 = arith.constant 0.000000e+00 : f32
    %8 = vector.broadcast %cst_8 : f32 to vector<8x64xf32>
    %c0_i32 = arith.constant 0 : i32
    %c8_i32 = arith.constant 8 : i32
    %9 = arith.muli %c0_i32, %c8_i32 : i32
    %10 = tpu.assume_multiple %9, 8 : i32
    %11 = arith.index_cast %10 : i32 to index
    %c0_9 = arith.constant 0 : index
    %12 = vector.load %arg9[%11, %c0_9] : memref<64x256xf32, #tpu.memory_space<vmem>>, vector<8x256xf32>
    %c0_10 = arith.constant 0 : index
    %c0_11 = arith.constant 0 : index
    %13 = vector.load %arg2[%c0_10, %c0_11] : memref<64x256xf32, #tpu.memory_space<vmem>>, vector<64x256xf32>
    %cst_12 = arith.constant dense<0.000000e+00> : vector<8x256xf32>
    %14 = tpu.matmul %7, %13, %cst_12 {dimension_numbers = #tpu.dot_dimension_numbers<[1], [0], [0], [1], [0, 0, 1, 1], [], []>} : vector<8x64xf32>, vector<64x256xf32>, vector<8x256xf32> -> vector<8x256xf32>
    %15 = arith.addf %12, %14 : vector<8x256xf32>
    %16 = vector.extract_strided_slice %15 {offsets = [0, 0], sizes = [8, 128], strides = [1, 1]} : vector<8x256xf32> to vector<8x128xf32>
    %17 = arith.negf %16 : vector<8x128xf32>
    %18 = math.exp %17 : vector<8x128xf32>
    %cst_13 = arith.constant 1.000000e+00 : f32
    %19 = vector.broadcast %cst_13 : f32 to vector<8x128xf32>
    %20 = arith.addf %19, %18 : vector<8x128xf32>
    %21 = arith.divf %19, %20 : vector<8x128xf32>
    %22 = vector.extract_strided_slice %21 {offsets = [0, 0], sizes = [8, 64], strides = [1, 1]} : vector<8x128xf32> to vector<8x64xf32>
    %23 = vector.extract_strided_slice %21 {offsets = [0, 64], sizes = [8, 64], strides = [1, 1]} : vector<8x128xf32> to vector<8x64xf32>
    %24 = vector.extract_strided_slice %15 {offsets = [0, 128], sizes = [8, 64], strides = [1, 1]} : vector<8x256xf32> to vector<8x64xf32>
    %25 = math.tanh %24 : vector<8x64xf32>
    %26 = vector.extract_strided_slice %15 {offsets = [0, 192], sizes = [8, 64], strides = [1, 1]} : vector<8x256xf32> to vector<8x64xf32>
    %27 = arith.negf %26 : vector<8x64xf32>
    %28 = math.exp %27 : vector<8x64xf32>
    %cst_14 = arith.constant 1.000000e+00 : f32
    %29 = vector.broadcast %cst_14 : f32 to vector<8x64xf32>
    %30 = arith.addf %29, %28 : vector<8x64xf32>
    %31 = arith.divf %29, %30 : vector<8x64xf32>
    %32 = arith.mulf %23, %8 : vector<8x64xf32>
    %33 = arith.mulf %22, %25 : vector<8x64xf32>
    %34 = arith.addf %32, %33 : vector<8x64xf32>
    %35 = math.tanh %34 : vector<8x64xf32>
    %36 = arith.mulf %31, %35 : vector<8x64xf32>
    %c1_i32 = arith.constant 1 : i32
    %c8_i32_15 = arith.constant 8 : i32
    %37 = arith.muli %c1_i32, %c8_i32_15 : i32
    %38 = tpu.assume_multiple %37, 8 : i32
    %39 = arith.index_cast %38 : i32 to index
    %c0_16 = arith.constant 0 : index
    %40 = vector.load %arg9[%39, %c0_16] : memref<64x256xf32, #tpu.memory_space<vmem>>, vector<8x256xf32>
    %c0_17 = arith.constant 0 : index
    %c0_18 = arith.constant 0 : index
    %41 = vector.load %arg2[%c0_17, %c0_18] : memref<64x256xf32, #tpu.memory_space<vmem>>, vector<64x256xf32>
    %cst_19 = arith.constant dense<0.000000e+00> : vector<8x256xf32>
    %42 = tpu.matmul %36, %41, %cst_19 {dimension_numbers = #tpu.dot_dimension_numbers<[1], [0], [0], [1], [0, 0, 1, 1], [], []>} : vector<8x64xf32>, vector<64x256xf32>, vector<8x256xf32> -> vector<8x256xf32>
    %43 = arith.addf %40, %42 : vector<8x256xf32>
    %44 = vector.extract_strided_slice %43 {offsets = [0, 0], sizes = [8, 128], strides = [1, 1]} : vector<8x256xf32> to vector<8x128xf32>
    %45 = arith.negf %44 : vector<8x128xf32>
    %46 = math.exp %45 : vector<8x128xf32>
    %cst_20 = arith.constant 1.000000e+00 : f32
    %47 = vector.broadcast %cst_20 : f32 to vector<8x128xf32>
    %48 = arith.addf %47, %46 : vector<8x128xf32>
    %49 = arith.divf %47, %48 : vector<8x128xf32>
    %50 = vector.extract_strided_slice %49 {offsets = [0, 0], sizes = [8, 64], strides = [1, 1]} : vector<8x128xf32> to vector<8x64xf32>
    %51 = vector.extract_strided_slice %49 {offsets = [0, 64], sizes = [8, 64], strides = [1, 1]} : vector<8x128xf32> to vector<8x64xf32>
    %52 = vector.extract_strided_slice %43 {offsets = [0, 128], sizes = [8, 64], strides = [1, 1]} : vector<8x256xf32> to vector<8x64xf32>
    %53 = math.tanh %52 : vector<8x64xf32>
    %54 = vector.extract_strided_slice %43 {offsets = [0, 192], sizes = [8, 64], strides = [1, 1]} : vector<8x256xf32> to vector<8x64xf32>
    %55 = arith.negf %54 : vector<8x64xf32>
    %56 = math.exp %55 : vector<8x64xf32>
    %cst_21 = arith.constant 1.000000e+00 : f32
    %57 = vector.broadcast %cst_21 : f32 to vector<8x64xf32>
    %58 = arith.addf %57, %56 : vector<8x64xf32>
    %59 = arith.divf %57, %58 : vector<8x64xf32>
    %60 = arith.mulf %51, %34 : vector<8x64xf32>
    %61 = arith.mulf %50, %53 : vector<8x64xf32>
    %62 = arith.addf %60, %61 : vector<8x64xf32>
    %63 = math.tanh %62 : vector<8x64xf32>
    %64 = arith.mulf %59, %63 : vector<8x64xf32>
    %c2_i32 = arith.constant 2 : i32
    %c8_i32_22 = arith.constant 8 : i32
    %65 = arith.muli %c2_i32, %c8_i32_22 : i32
    %66 = tpu.assume_multiple %65, 8 : i32
    %67 = arith.index_cast %66 : i32 to index
    %c0_23 = arith.constant 0 : index
    %68 = vector.load %arg9[%67, %c0_23] : memref<64x256xf32, #tpu.memory_space<vmem>>, vector<8x256xf32>
    %c0_24 = arith.constant 0 : index
    %c0_25 = arith.constant 0 : index
    %69 = vector.load %arg2[%c0_24, %c0_25] : memref<64x256xf32, #tpu.memory_space<vmem>>, vector<64x256xf32>
    %cst_26 = arith.constant dense<0.000000e+00> : vector<8x256xf32>
    %70 = tpu.matmul %64, %69, %cst_26 {dimension_numbers = #tpu.dot_dimension_numbers<[1], [0], [0], [1], [0, 0, 1, 1], [], []>} : vector<8x64xf32>, vector<64x256xf32>, vector<8x256xf32> -> vector<8x256xf32>
    %71 = arith.addf %68, %70 : vector<8x256xf32>
    %72 = vector.extract_strided_slice %71 {offsets = [0, 0], sizes = [8, 128], strides = [1, 1]} : vector<8x256xf32> to vector<8x128xf32>
    %73 = arith.negf %72 : vector<8x128xf32>
    %74 = math.exp %73 : vector<8x128xf32>
    %cst_27 = arith.constant 1.000000e+00 : f32
    %75 = vector.broadcast %cst_27 : f32 to vector<8x128xf32>
    %76 = arith.addf %75, %74 : vector<8x128xf32>
    %77 = arith.divf %75, %76 : vector<8x128xf32>
    %78 = vector.extract_strided_slice %77 {offsets = [0, 0], sizes = [8, 64], strides = [1, 1]} : vector<8x128xf32> to vector<8x64xf32>
    %79 = vector.extract_strided_slice %77 {offsets = [0, 64], sizes = [8, 64], strides = [1, 1]} : vector<8x128xf32> to vector<8x64xf32>
    %80 = vector.extract_strided_slice %71 {offsets = [0, 128], sizes = [8, 64], strides = [1, 1]} : vector<8x256xf32> to vector<8x64xf32>
    %81 = math.tanh %80 : vector<8x64xf32>
    %82 = vector.extract_strided_slice %71 {offsets = [0, 192], sizes = [8, 64], strides = [1, 1]} : vector<8x256xf32> to vector<8x64xf32>
    %83 = arith.negf %82 : vector<8x64xf32>
    %84 = math.exp %83 : vector<8x64xf32>
    %cst_28 = arith.constant 1.000000e+00 : f32
    %85 = vector.broadcast %cst_28 : f32 to vector<8x64xf32>
    %86 = arith.addf %85, %84 : vector<8x64xf32>
    %87 = arith.divf %85, %86 : vector<8x64xf32>
    %88 = arith.mulf %79, %62 : vector<8x64xf32>
    %89 = arith.mulf %78, %81 : vector<8x64xf32>
    %90 = arith.addf %88, %89 : vector<8x64xf32>
    %91 = math.tanh %90 : vector<8x64xf32>
    %92 = arith.mulf %87, %91 : vector<8x64xf32>
    %c3_i32 = arith.constant 3 : i32
    %c8_i32_29 = arith.constant 8 : i32
    %93 = arith.muli %c3_i32, %c8_i32_29 : i32
    %94 = tpu.assume_multiple %93, 8 : i32
    %95 = arith.index_cast %94 : i32 to index
    %c0_30 = arith.constant 0 : index
    %96 = vector.load %arg9[%95, %c0_30] : memref<64x256xf32, #tpu.memory_space<vmem>>, vector<8x256xf32>
    %c0_31 = arith.constant 0 : index
    %c0_32 = arith.constant 0 : index
    %97 = vector.load %arg2[%c0_31, %c0_32] : memref<64x256xf32, #tpu.memory_space<vmem>>, vector<64x256xf32>
    %cst_33 = arith.constant dense<0.000000e+00> : vector<8x256xf32>
    %98 = tpu.matmul %92, %97, %cst_33 {dimension_numbers = #tpu.dot_dimension_numbers<[1], [0], [0], [1], [0, 0, 1, 1], [], []>} : vector<8x64xf32>, vector<64x256xf32>, vector<8x256xf32> -> vector<8x256xf32>
    %99 = arith.addf %96, %98 : vector<8x256xf32>
    %100 = vector.extract_strided_slice %99 {offsets = [0, 0], sizes = [8, 128], strides = [1, 1]} : vector<8x256xf32> to vector<8x128xf32>
    %101 = arith.negf %100 : vector<8x128xf32>
    %102 = math.exp %101 : vector<8x128xf32>
    %cst_34 = arith.constant 1.000000e+00 : f32
    %103 = vector.broadcast %cst_34 : f32 to vector<8x128xf32>
    %104 = arith.addf %103, %102 : vector<8x128xf32>
    %105 = arith.divf %103, %104 : vector<8x128xf32>
    %106 = vector.extract_strided_slice %105 {offsets = [0, 0], sizes = [8, 64], strides = [1, 1]} : vector<8x128xf32> to vector<8x64xf32>
    %107 = vector.extract_strided_slice %105 {offsets = [0, 64], sizes = [8, 64], strides = [1, 1]} : vector<8x128xf32> to vector<8x64xf32>
    %108 = vector.extract_strided_slice %99 {offsets = [0, 128], sizes = [8, 64], strides = [1, 1]} : vector<8x256xf32> to vector<8x64xf32>
    %109 = math.tanh %108 : vector<8x64xf32>
    %110 = vector.extract_strided_slice %99 {offsets = [0, 192], sizes = [8, 64], strides = [1, 1]} : vector<8x256xf32> to vector<8x64xf32>
    %111 = arith.negf %110 : vector<8x64xf32>
    %112 = math.exp %111 : vector<8x64xf32>
    %cst_35 = arith.constant 1.000000e+00 : f32
    %113 = vector.broadcast %cst_35 : f32 to vector<8x64xf32>
    %114 = arith.addf %113, %112 : vector<8x64xf32>
    %115 = arith.divf %113, %114 : vector<8x64xf32>
    %116 = arith.mulf %107, %90 : vector<8x64xf32>
    %117 = arith.mulf %106, %109 : vector<8x64xf32>
    %118 = arith.addf %116, %117 : vector<8x64xf32>
    %119 = math.tanh %118 : vector<8x64xf32>
    %120 = arith.mulf %115, %119 : vector<8x64xf32>
    %c4_i32 = arith.constant 4 : i32
    %c8_i32_36 = arith.constant 8 : i32
    %121 = arith.muli %c4_i32, %c8_i32_36 : i32
    %122 = tpu.assume_multiple %121, 8 : i32
    %123 = arith.index_cast %122 : i32 to index
    %c0_37 = arith.constant 0 : index
    %124 = vector.load %arg9[%123, %c0_37] : memref<64x256xf32, #tpu.memory_space<vmem>>, vector<8x256xf32>
    %c0_38 = arith.constant 0 : index
    %c0_39 = arith.constant 0 : index
    %125 = vector.load %arg2[%c0_38, %c0_39] : memref<64x256xf32, #tpu.memory_space<vmem>>, vector<64x256xf32>
    %cst_40 = arith.constant dense<0.000000e+00> : vector<8x256xf32>
    %126 = tpu.matmul %120, %125, %cst_40 {dimension_numbers = #tpu.dot_dimension_numbers<[1], [0], [0], [1], [0, 0, 1, 1], [], []>} : vector<8x64xf32>, vector<64x256xf32>, vector<8x256xf32> -> vector<8x256xf32>
    %127 = arith.addf %124, %126 : vector<8x256xf32>
    %128 = vector.extract_strided_slice %127 {offsets = [0, 0], sizes = [8, 128], strides = [1, 1]} : vector<8x256xf32> to vector<8x128xf32>
    %129 = arith.negf %128 : vector<8x128xf32>
    %130 = math.exp %129 : vector<8x128xf32>
    %cst_41 = arith.constant 1.000000e+00 : f32
    %131 = vector.broadcast %cst_41 : f32 to vector<8x128xf32>
    %132 = arith.addf %131, %130 : vector<8x128xf32>
    %133 = arith.divf %131, %132 : vector<8x128xf32>
    %134 = vector.extract_strided_slice %133 {offsets = [0, 0], sizes = [8, 64], strides = [1, 1]} : vector<8x128xf32> to vector<8x64xf32>
    %135 = vector.extract_strided_slice %133 {offsets = [0, 64], sizes = [8, 64], strides = [1, 1]} : vector<8x128xf32> to vector<8x64xf32>
    %136 = vector.extract_strided_slice %127 {offsets = [0, 128], sizes = [8, 64], strides = [1, 1]} : vector<8x256xf32> to vector<8x64xf32>
    %137 = math.tanh %136 : vector<8x64xf32>
    %138 = vector.extract_strided_slice %127 {offsets = [0, 192], sizes = [8, 64], strides = [1, 1]} : vector<8x256xf32> to vector<8x64xf32>
    %139 = arith.negf %138 : vector<8x64xf32>
    %140 = math.exp %139 : vector<8x64xf32>
    %cst_42 = arith.constant 1.000000e+00 : f32
    %141 = vector.broadcast %cst_42 : f32 to vector<8x64xf32>
    %142 = arith.addf %141, %140 : vector<8x64xf32>
    %143 = arith.divf %141, %142 : vector<8x64xf32>
    %144 = arith.mulf %135, %118 : vector<8x64xf32>
    %145 = arith.mulf %134, %137 : vector<8x64xf32>
    %146 = arith.addf %144, %145 : vector<8x64xf32>
    %147 = math.tanh %146 : vector<8x64xf32>
    %148 = arith.mulf %143, %147 : vector<8x64xf32>
    %c5_i32 = arith.constant 5 : i32
    %c8_i32_43 = arith.constant 8 : i32
    %149 = arith.muli %c5_i32, %c8_i32_43 : i32
    %150 = tpu.assume_multiple %149, 8 : i32
    %151 = arith.index_cast %150 : i32 to index
    %c0_44 = arith.constant 0 : index
    %152 = vector.load %arg9[%151, %c0_44] : memref<64x256xf32, #tpu.memory_space<vmem>>, vector<8x256xf32>
    %c0_45 = arith.constant 0 : index
    %c0_46 = arith.constant 0 : index
    %153 = vector.load %arg2[%c0_45, %c0_46] : memref<64x256xf32, #tpu.memory_space<vmem>>, vector<64x256xf32>
    %cst_47 = arith.constant dense<0.000000e+00> : vector<8x256xf32>
    %154 = tpu.matmul %148, %153, %cst_47 {dimension_numbers = #tpu.dot_dimension_numbers<[1], [0], [0], [1], [0, 0, 1, 1], [], []>} : vector<8x64xf32>, vector<64x256xf32>, vector<8x256xf32> -> vector<8x256xf32>
    %155 = arith.addf %152, %154 : vector<8x256xf32>
    %156 = vector.extract_strided_slice %155 {offsets = [0, 0], sizes = [8, 128], strides = [1, 1]} : vector<8x256xf32> to vector<8x128xf32>
    %157 = arith.negf %156 : vector<8x128xf32>
    %158 = math.exp %157 : vector<8x128xf32>
    %cst_48 = arith.constant 1.000000e+00 : f32
    %159 = vector.broadcast %cst_48 : f32 to vector<8x128xf32>
    %160 = arith.addf %159, %158 : vector<8x128xf32>
    %161 = arith.divf %159, %160 : vector<8x128xf32>
    %162 = vector.extract_strided_slice %161 {offsets = [0, 0], sizes = [8, 64], strides = [1, 1]} : vector<8x128xf32> to vector<8x64xf32>
    %163 = vector.extract_strided_slice %161 {offsets = [0, 64], sizes = [8, 64], strides = [1, 1]} : vector<8x128xf32> to vector<8x64xf32>
    %164 = vector.extract_strided_slice %155 {offsets = [0, 128], sizes = [8, 64], strides = [1, 1]} : vector<8x256xf32> to vector<8x64xf32>
    %165 = math.tanh %164 : vector<8x64xf32>
    %166 = vector.extract_strided_slice %155 {offsets = [0, 192], sizes = [8, 64], strides = [1, 1]} : vector<8x256xf32> to vector<8x64xf32>
    %167 = arith.negf %166 : vector<8x64xf32>
    %168 = math.exp %167 : vector<8x64xf32>
    %cst_49 = arith.constant 1.000000e+00 : f32
    %169 = vector.broadcast %cst_49 : f32 to vector<8x64xf32>
    %170 = arith.addf %169, %168 : vector<8x64xf32>
    %171 = arith.divf %169, %170 : vector<8x64xf32>
    %172 = arith.mulf %163, %146 : vector<8x64xf32>
    %173 = arith.mulf %162, %165 : vector<8x64xf32>
    %174 = arith.addf %172, %173 : vector<8x64xf32>
    %175 = math.tanh %174 : vector<8x64xf32>
    %176 = arith.mulf %171, %175 : vector<8x64xf32>
    %c6_i32 = arith.constant 6 : i32
    %c8_i32_50 = arith.constant 8 : i32
    %177 = arith.muli %c6_i32, %c8_i32_50 : i32
    %178 = tpu.assume_multiple %177, 8 : i32
    %179 = arith.index_cast %178 : i32 to index
    %c0_51 = arith.constant 0 : index
    %180 = vector.load %arg9[%179, %c0_51] : memref<64x256xf32, #tpu.memory_space<vmem>>, vector<8x256xf32>
    %c0_52 = arith.constant 0 : index
    %c0_53 = arith.constant 0 : index
    %181 = vector.load %arg2[%c0_52, %c0_53] : memref<64x256xf32, #tpu.memory_space<vmem>>, vector<64x256xf32>
    %cst_54 = arith.constant dense<0.000000e+00> : vector<8x256xf32>
    %182 = tpu.matmul %176, %181, %cst_54 {dimension_numbers = #tpu.dot_dimension_numbers<[1], [0], [0], [1], [0, 0, 1, 1], [], []>} : vector<8x64xf32>, vector<64x256xf32>, vector<8x256xf32> -> vector<8x256xf32>
    %183 = arith.addf %180, %182 : vector<8x256xf32>
    %184 = vector.extract_strided_slice %183 {offsets = [0, 0], sizes = [8, 128], strides = [1, 1]} : vector<8x256xf32> to vector<8x128xf32>
    %185 = arith.negf %184 : vector<8x128xf32>
    %186 = math.exp %185 : vector<8x128xf32>
    %cst_55 = arith.constant 1.000000e+00 : f32
    %187 = vector.broadcast %cst_55 : f32 to vector<8x128xf32>
    %188 = arith.addf %187, %186 : vector<8x128xf32>
    %189 = arith.divf %187, %188 : vector<8x128xf32>
    %190 = vector.extract_strided_slice %189 {offsets = [0, 0], sizes = [8, 64], strides = [1, 1]} : vector<8x128xf32> to vector<8x64xf32>
    %191 = vector.extract_strided_slice %189 {offsets = [0, 64], sizes = [8, 64], strides = [1, 1]} : vector<8x128xf32> to vector<8x64xf32>
    %192 = vector.extract_strided_slice %183 {offsets = [0, 128], sizes = [8, 64], strides = [1, 1]} : vector<8x256xf32> to vector<8x64xf32>
    %193 = math.tanh %192 : vector<8x64xf32>
    %194 = vector.extract_strided_slice %183 {offsets = [0, 192], sizes = [8, 64], strides = [1, 1]} : vector<8x256xf32> to vector<8x64xf32>
    %195 = arith.negf %194 : vector<8x64xf32>
    %196 = math.exp %195 : vector<8x64xf32>
    %cst_56 = arith.constant 1.000000e+00 : f32
    %197 = vector.broadcast %cst_56 : f32 to vector<8x64xf32>
    %198 = arith.addf %197, %196 : vector<8x64xf32>
    %199 = arith.divf %197, %198 : vector<8x64xf32>
    %200 = arith.mulf %191, %174 : vector<8x64xf32>
    %201 = arith.mulf %190, %193 : vector<8x64xf32>
    %202 = arith.addf %200, %201 : vector<8x64xf32>
    %203 = math.tanh %202 : vector<8x64xf32>
    %204 = arith.mulf %199, %203 : vector<8x64xf32>
    %c7_i32 = arith.constant 7 : i32
    %c8_i32_57 = arith.constant 8 : i32
    %205 = arith.muli %c7_i32, %c8_i32_57 : i32
    %206 = tpu.assume_multiple %205, 8 : i32
    %207 = arith.index_cast %206 : i32 to index
    %c0_58 = arith.constant 0 : index
    %208 = vector.load %arg9[%207, %c0_58] : memref<64x256xf32, #tpu.memory_space<vmem>>, vector<8x256xf32>
    %c0_59 = arith.constant 0 : index
    %c0_60 = arith.constant 0 : index
    %209 = vector.load %arg2[%c0_59, %c0_60] : memref<64x256xf32, #tpu.memory_space<vmem>>, vector<64x256xf32>
    %cst_61 = arith.constant dense<0.000000e+00> : vector<8x256xf32>
    %210 = tpu.matmul %204, %209, %cst_61 {dimension_numbers = #tpu.dot_dimension_numbers<[1], [0], [0], [1], [0, 0, 1, 1], [], []>} : vector<8x64xf32>, vector<64x256xf32>, vector<8x256xf32> -> vector<8x256xf32>
    %211 = arith.addf %208, %210 : vector<8x256xf32>
    %212 = vector.extract_strided_slice %211 {offsets = [0, 0], sizes = [8, 128], strides = [1, 1]} : vector<8x256xf32> to vector<8x128xf32>
    %213 = arith.negf %212 : vector<8x128xf32>
    %214 = math.exp %213 : vector<8x128xf32>
    %cst_62 = arith.constant 1.000000e+00 : f32
    %215 = vector.broadcast %cst_62 : f32 to vector<8x128xf32>
    %216 = arith.addf %215, %214 : vector<8x128xf32>
    %217 = arith.divf %215, %216 : vector<8x128xf32>
    %218 = vector.extract_strided_slice %217 {offsets = [0, 0], sizes = [8, 64], strides = [1, 1]} : vector<8x128xf32> to vector<8x64xf32>
    %219 = vector.extract_strided_slice %217 {offsets = [0, 64], sizes = [8, 64], strides = [1, 1]} : vector<8x128xf32> to vector<8x64xf32>
    %220 = vector.extract_strided_slice %211 {offsets = [0, 128], sizes = [8, 64], strides = [1, 1]} : vector<8x256xf32> to vector<8x64xf32>
    %221 = math.tanh %220 : vector<8x64xf32>
    %222 = vector.extract_strided_slice %211 {offsets = [0, 192], sizes = [8, 64], strides = [1, 1]} : vector<8x256xf32> to vector<8x64xf32>
    %223 = arith.negf %222 : vector<8x64xf32>
    %224 = math.exp %223 : vector<8x64xf32>
    %cst_63 = arith.constant 1.000000e+00 : f32
    %225 = vector.broadcast %cst_63 : f32 to vector<8x64xf32>
    %226 = arith.addf %225, %224 : vector<8x64xf32>
    %227 = arith.divf %225, %226 : vector<8x64xf32>
    %228 = arith.mulf %219, %202 : vector<8x64xf32>
    %229 = arith.mulf %218, %221 : vector<8x64xf32>
    %230 = arith.addf %228, %229 : vector<8x64xf32>
    %231 = math.tanh %230 : vector<8x64xf32>
    %232 = arith.mulf %227, %231 : vector<8x64xf32>
    %c8_i32_64 = arith.constant 8 : i32
    %c0_65 = arith.constant 0 : index
    %c0_66 = arith.constant 0 : index
    %233 = vector.load %arg4[%c0_65, %c0_66] : memref<64x3xf32, #tpu.memory_space<vmem>>, vector<64x3xf32>
    %cst_67 = arith.constant dense<0.000000e+00> : vector<8x3xf32>
    %234 = tpu.matmul %232, %233, %cst_67 {dimension_numbers = #tpu.dot_dimension_numbers<[1], [0], [0], [1], [0, 0, 1, 1], [], []>} : vector<8x64xf32>, vector<64x3xf32>, vector<8x3xf32> -> vector<8x3xf32>
    %c0_68 = arith.constant 0 : index
    %c0_69 = arith.constant 0 : index
    %235 = vector.load %arg5[%c0_68, %c0_69] : memref<1x3xf32, #tpu.memory_space<vmem>>, vector<1x3xf32>
    %236 = vector.broadcast %235 : vector<1x3xf32> to vector<8x3xf32>
    %237 = arith.addf %234, %236 : vector<8x3xf32>
    %cst_70 = arith.constant dense<0xFF800000> : vector<8xf32>
    %238 = vector.multi_reduction <maximumf>, %237, %cst_70 [1] : vector<8x3xf32> to vector<8xf32>
    %239 = vector.shape_cast %238 : vector<8xf32> to vector<8x1xf32>
    %240 = vector.broadcast %239 : vector<8x1xf32> to vector<8x3xf32>
    %241 = arith.subf %237, %240 : vector<8x3xf32>
    %242 = math.exp %241 : vector<8x3xf32>
    %cst_71 = arith.constant dense<0.000000e+00> : vector<8xf32>
    %243 = vector.multi_reduction <add>, %242, %cst_71 [1] : vector<8x3xf32> to vector<8xf32>
    %244 = vector.shape_cast %243 : vector<8xf32> to vector<8x1xf32>
    %245 = vector.broadcast %244 : vector<8x1xf32> to vector<8x3xf32>
    %246 = arith.divf %242, %245 : vector<8x3xf32>
    %c0_72 = arith.constant 0 : index
    %c0_73 = arith.constant 0 : index
    %247 = vector.load %arg6[%c0_72, %c0_73] : memref<8x3xf32, #tpu.memory_space<vmem>>, vector<8x3xf32>
    tpu.vector_store %arg6[%c0_72, %c0_73], %246 {strides = array<i32>} : memref<8x3xf32, #tpu.memory_space<vmem>>, vector<8x3xf32>,
    %c0_74 = arith.constant 0 : index
    %c0_75 = arith.constant 0 : index
    %248 = vector.load %arg7[%c0_74, %c0_75] : memref<8x64xf32, #tpu.memory_space<vmem>>, vector<8x64xf32>
    tpu.vector_store %arg7[%c0_74, %c0_75], %232 {strides = array<i32>} : memref<8x64xf32, #tpu.memory_space<vmem>>, vector<8x64xf32>,
    %c0_76 = arith.constant 0 : index
    %c0_77 = arith.constant 0 : index
    %249 = vector.load %arg8[%c0_76, %c0_77] : memref<8x64xf32, #tpu.memory_space<vmem>>, vector<8x64xf32>
    tpu.vector_store %arg8[%c0_76, %c0_77], %230 {strides = array<i32>} : memref<8x64xf32, #tpu.memory_space<vmem>>, vector<8x64xf32>,
    return
  }
}

</mosaic_0001>

<bundles_post_ra>
// kernel: lstm_controller_forward.1
= control target key start
LH: loop header
LB: loop body
LE: loop exit
PB: predicated region body
PF: predicated region fallthrough
CT: control target
= control target key end

     0   :  { %14 = vsyncpa [#allocation4], 0  ;;  %s1275_s30 = smov [#allocation3]   ;;  %s1276_s10 = smov 256   ;;  %s1714_s0 = inlined_call_operand.vmem [shape: f32[64,32], index: 0, kind: input, shape index: {}]   ;;  %s1715_s1 = inlined_call_operand.hbm [shape: f32[32,256], index: 1, kind: input, shape index: {}]   ;;  %s1716_s2 = inlined_call_operand.vmem [shape: f32[64,256], index: 2, kind: input, shape index: {}]   ;;  %s1717_s3 = inlined_call_operand.vmem [shape: f32[1,256], index: 3, kind: input, shape index: {}]   ;;  %s1718_s4 = inlined_call_operand.vmem [shape: f32[64,3], index: 4, kind: input, shape index: {}]   ;;  %s1719_s5 = inlined_call_operand.vmem [shape: f32[1,3], index: 5, kind: input, shape index: {}]   ;;  %s1720_s6 = inlined_call_operand.vmem [shape: f32[8,3], index: 6, kind: output, shape index: {0}]   ;;  %s1721_s7 = inlined_call_operand.vmem [shape: f32[8,64], index: 7, kind: output, shape index: {1}]   ;;  %s1722_s8 = inlined_call_operand.vmem [shape: f32[8,64], index: 8, kind: output, shape index: {2}]  }
   0x1   :  { %s21_s29 = sshll.u32 %s1715_s1, 4  ;;  %s23_s9 = sshll.u32 %s1275_s30, 4  ;;  %s22_s29 = int_to_ptr.hbm [resolvable:$true] %s21_s29  ;;  %s24_s9 = int_to_ptr.vmem [resolvable:$true] %s23_s9 }
   0x2   :  { %s1277_s11 = smov 16  }
   0x3   :  { %29 = dma.hbm_to_vmem [thread:$0]  %s22_s29, 1024, %s24_s9, [#allocation4], %s1276_s10, %s1276_s10, %s1277_s11  }
   0x4   :  { %1273 = dma.done.wait [#allocation4], 1024  }
   0x5   :  { %1274 = vsyncadd [#allocation4], 4294966272  ;;  %v1331_v0 = vld [vmem:[%s1716_s2 + $0x70] sm:$0xff]  ;;  %v1336_v1 = vld [vmem:[%s1716_s2 + $0x60] sm:$0xff]  ;;  %vm64_vm0 = vcmask 261120   ;;  %v1278_v25 = vmov 0.0  }
   0x6   :  { %220 = vmatpush.msra.mxu2 %v1331_v0  ;;  %v1342_v2 = vld [vmem:[%s1716_s2 + $0x78] sm:$0xff]  ;;  %v1347_v3 = vld [vmem:[%s1716_s2 + $0x50] sm:$0xff]  ;;  %v1353_v4 = vld [vmem:[%s1716_s2 + $0x68] sm:$0xff]  ;;  %vm208_vm9 = vcmask 523264  }
   0x7   :  { %240 = vmatpush.msra.mxu3 %v1342_v2  ;;  %v56_v5 = vld [vmem:[#allocation3 + $0x30] sm:$0xff]  ;;  %v1359_v6 = vld [vmem:[%s1716_s2 + $0x58] sm:$0xff]  ;;  %v54_v7 = vld [vmem:[#allocation3 + $0x20] sm:$0xff] }
   0x8   :  { %221 = vmatpush.msra.mxu2 %v1336_v1  ;;  %101 = vmatpush.msra.mxu0 %v56_v5  ;;  %v1364_v8 = vld [vmem:[%s1716_s2 + $0x40] sm:$0xff]  ;;  %v52_v9 = vld [vmem:[#allocation3 + $0x10] sm:$0xff]  ;;  %v1371_v10 = vld [vmem:[%s1716_s2 + $0x48] sm:$0xff] }
   0x9   :  { %241 = vmatpush.msra.mxu3 %v1353_v4  ;;  %1139 = vmatpush.msra.mxu1 %v56_v5  ;;  %v1376_v11 = vld [vmem:[%s1716_s2 + $0x30] sm:$0xff]  ;;  %v50_v12 = vld [vmem:[#allocation3] sm:$0xff]  ;;  %v1383_v13 = vld [vmem:[%s1716_s2 + $0x38] sm:$0xff] }
   0xa   :  { %222 = vmatpush.msra.mxu2 %v1347_v3  ;;  %102 = vmatpush.msra.mxu0 %v54_v7  ;;  %v1388_v14 = vld [vmem:[%s1716_s2 + $0x20] sm:$0xff]  ;;  %v1398_v16 = vld [vmem:[%s1716_s2 + $0x28] sm:$0xff]  ;;  %v1403_v17 = vld [vmem:[%s1714_s0 + $0x38] sm:$0xff] }
   0xb   :  { %242 = vmatpush.msra.mxu3 %v1359_v6  ;;  %1140 = vmatpush.msra.mxu1 %v54_v7  ;;  %v42_v15 = vld [vmem:[%s1714_s0] sm:$0xff]  ;;  %v1408_v18 = vld [vmem:[%s1716_s2 + $0x10] sm:$0xff]  ;;  %v57_v19 = vld [vmem:[#allocation3 + $0x38] sm:$0xff] }
   0xc   :  { %223 = vmatpush.msra.mxu2 %v1364_v8  ;;  %103 = vmatpush.msra.mxu0 %v52_v9  ;;  %v1416_v20 = vld [vmem:[%s1716_s2 + $0x18] sm:$0xff]  ;;  %v1421_v21 = vld [vmem:[%s1716_s2] sm:$0xff]  ;;  %v55_v22 = vld [vmem:[#allocation3 + $0x28] sm:$0xff] }
   0xd   :  { %243 = vmatpush.msra.mxu3 %v1371_v10  ;;  %1141 = vmatpush.msra.mxu1 %v52_v9  ;;  %v1430_v23 = vld [vmem:[%s1716_s2 + $0x8] sm:$0xff]  ;;  %v53_v24 = vld [vmem:[#allocation3 + $0x18] sm:$0xff]  ;;  %v58_v27 = vld [vmem:[%s1717_s3] sm:$0x3]  ;;  %s1279_s3 = smov 64  }
   0xe   :  { %224 = vmatpush.msra.mxu2 %v1376_v11  ;;  %104 = vmatpush.msra.mxu0 %v50_v12  ;;  %v51_v26 = vld [vmem:[#allocation3 + $0x8] sm:$0xff]  ;;  %v1503_v28 = vperm.slane %v58_v27, 0  ;;  %v1508_v37 = vperm.slane %v58_v27, 1 }
   0xf   :  { %244 = vmatpush.msra.mxu3 %v1383_v13  ;;  %1142 = vmatpush.msra.mxu1 %v50_v12 }
  0x10   :  { %225 = vmatpush.msra.mxu2 %v1388_v14  ;;  %1092 = vmatmul.msk.f32.vlgmr.msra.gmra.mxu0 %vm64_vm0, %v42_v15 }
  0x11   :  { %245 = vmatpush.msra.mxu3 %v1398_v16  ;;  %1099 = vmatmul.msk.f32.vlgmr.msra.gmra.mxu1 %vm64_vm0, %v1403_v17 }
  0x12   :  { %226 = vmatpush.msra.mxu2 %v1408_v18  ;;  %142 = vmatpush.msrb.mxu1 %v57_v19 }
  0x13   :  { %246 = vmatpush.msra.mxu3 %v1416_v20  ;;  %620 = vmatpush.msrb.mxu0 %v1331_v0 }
  0x14   :  { %227 = vmatpush.msra.mxu2 %v1421_v21  ;;  %143 = vmatpush.msrb.mxu1 %v55_v22 }
  0x15   :  { %228 = vmatmul.f32.vlgmr.msra.gmra.mxu2 %v1278_v25  ;;  %247 = vmatpush.msra.mxu3 %v1430_v23 }
  0x16   :  { %248 = vmatmul.f32.vlgmr.msra.gmra.mxu3 %v1278_v25  ;;  %144 = vmatpush.msrb.mxu1 %v53_v24  ;;  %v43_v25 = vld [vmem:[%s1714_s0 + $0x8] sm:$0xff] }
  0x17   :  { %320 = vmatpush.msrb.mxu2 %v1331_v0  ;;  %340 = vmatpush.msrb.mxu3 %v1342_v2 }
  0x18   :  { %145 = vmatpush.msrb.mxu1 %v51_v26  ;;  %621 = vmatpush.msrb.mxu0 %v1336_v1 }
  0x19   :  { %1100 = vmatmul.msk.f32.vlgmr.msrb.gmra.mxu1 %vm64_vm0, %v42_v15  ;;  %321 = vmatpush.msrb.mxu2 %v1336_v1 }
  0x1a   :  { %341 = vmatpush.msrb.mxu3 %v1353_v4  ;;  %640 = vmatpush.msra.mxu1 %v1342_v2 }
  0x1b   :  { %322 = vmatpush.msrb.mxu2 %v1347_v3  ;;  %622 = vmatpush.msrb.mxu0 %v1347_v3 }
  0x1c   :  { %342 = vmatpush.msrb.mxu3 %v1359_v6  ;;  %641 = vmatpush.msra.mxu1 %v1353_v4 }
  0x1d   :  { %323 = vmatpush.msrb.mxu2 %v1364_v8  ;;  %623 = vmatpush.msrb.mxu0 %v1364_v8 }
  0x1e   :  { %343 = vmatpush.msrb.mxu3 %v1371_v10  ;;  %642 = vmatpush.msra.mxu1 %v1359_v6 }
  0x1f   :  { %324 = vmatpush.msrb.mxu2 %v1376_v11  ;;  %624 = vmatpush.msrb.mxu0 %v1376_v11 }
  0x20   :  { %344 = vmatpush.msrb.mxu3 %v1383_v13  ;;  %643 = vmatpush.msra.mxu1 %v1371_v10 }
  0x21   :  { %325 = vmatpush.msrb.mxu2 %v1388_v14  ;;  %625 = vmatpush.msrb.mxu0 %v1388_v14 }
  0x22   :  { %345 = vmatpush.msrb.mxu3 %v1398_v16  ;;  %644 = vmatpush.msra.mxu1 %v1383_v13 }
  0x23   :  { %326 = vmatpush.msrb.mxu2 %v1408_v18  ;;  %626 = vmatpush.msrb.mxu0 %v1408_v18 }
  0x24   :  { %346 = vmatpush.msrb.mxu3 %v1416_v20  ;;  %645 = vmatpush.msra.mxu1 %v1398_v16 }
  0x25   :  { %327 = vmatpush.msrb.mxu2 %v1421_v21  ;;  %627 = vmatpush.msrb.mxu0 %v1421_v21 }
  0x26   :  { %347 = vmatpush.msrb.mxu3 %v1430_v23  ;;  %646 = vmatpush.msra.mxu1 %v1416_v20 }
  0x27   :  { %420 = vmatpush.msra.mxu2 %v1331_v0  ;;  %820 = vmatpush.msra.mxu0 %v1331_v0 }
  0x28   :  { %440 = vmatpush.msra.mxu3 %v1342_v2  ;;  %647 = vmatpush.msra.mxu1 %v1430_v23 }
  0x29   :  { %421 = vmatpush.msra.mxu2 %v1336_v1  ;;  %821 = vmatpush.msra.mxu0 %v1336_v1 }
  0x2a   :  { %441 = vmatpush.msra.mxu3 %v1353_v4  ;;  %840 = vmatpush.msrb.mxu1 %v1342_v2 }
  0x2b   :  { %422 = vmatpush.msra.mxu2 %v1347_v3  ;;  %822 = vmatpush.msra.mxu0 %v1347_v3 }
  0x2c   :  { %442 = vmatpush.msra.mxu3 %v1359_v6  ;;  %841 = vmatpush.msrb.mxu1 %v1353_v4 }
  0x2d   :  { %423 = vmatpush.msra.mxu2 %v1364_v8  ;;  %823 = vmatpush.msra.mxu0 %v1364_v8 }
  0x2e   :  { %443 = vmatpush.msra.mxu3 %v1371_v10  ;;  %842 = vmatpush.msrb.mxu1 %v1359_v6 }
  0x2f   :  { %424 = vmatpush.msra.mxu2 %v1376_v11  ;;  %824 = vmatpush.msra.mxu0 %v1376_v11 }
  0x30   :  { %444 = vmatpush.msra.mxu3 %v1383_v13  ;;  %843 = vmatpush.msrb.mxu1 %v1371_v10 }
  0x31   :  { %425 = vmatpush.msra.mxu2 %v1388_v14  ;;  %825 = vmatpush.msra.mxu0 %v1388_v14 }
  0x32   :  { %445 = vmatpush.msra.mxu3 %v1398_v16  ;;  %844 = vmatpush.msrb.mxu1 %v1383_v13 }
  0x33   :  { %426 = vmatpush.msra.mxu2 %v1408_v18  ;;  %826 = vmatpush.msra.mxu0 %v1408_v18 }
  0x34   :  { %446 = vmatpush.msra.mxu3 %v1416_v20  ;;  %845 = vmatpush.msrb.mxu1 %v1398_v16 }
  0x35   :  { %427 = vmatpush.msra.mxu2 %v1421_v21  ;;  %827 = vmatpush.msra.mxu0 %v1421_v21 }
  0x36   :  { %447 = vmatpush.msra.mxu3 %v1430_v23  ;;  %846 = vmatpush.msrb.mxu1 %v1416_v20 }
  0x37   :  { %1093 = vmatmul.msk.f32.gmra.mxu0 %vm64_vm0, %v43_v25  ;;  %1101 = vmatmul.msk.f32.gmra.mxu1 %vm64_vm0, %v43_v25 }
  0x38   :  { %847 = vmatpush.msrb.mxu1 %v1430_v23 }
  0x8d   :  { %v106_v29 = vpop.f32.mrf.mxu0 }
  0x8e   :  { %v107_v30 = vadd.f32 %v106_v29, %v1503_v28  ;;  %v1506_v33 = vpop.f32.mrf.mxu1 }
  0x96   :  { %v147_v38 = vpop.f32.mrf.mxu1 }
  0x97   :  { %v148_v39 = vadd.f32 %v147_v38, %v1508_v37 }
  0x98   :  { %v229_v31 = vpop.f32.mrf.mxu2 }
  0x99   :  { %v252_v32 = vadd.f32 %v229_v31, %v107_v30  ;;  %v249_v40 = vpop.f32.mrf.mxu3 }
  0x9a   :  { %v253_v42 = vadd.f32 %v249_v40, %v148_v39 }
  0x9b   :  { %v1108_v34 = vmul.f32 -1.442695, %v252_v32 }
  0x9c   :  { %v1109_v54 = vmul.f32 -1.442695, %v253_v42 }
  0x9d   :  { %1149 = vpow2.f32 %v1108_v34 }
  0xa3   :  { %v1150_v35 = vpop.eup %1149 }
  0xa4   :  { %v257_v36 = vadd.f32 1.0, %v1150_v35 }
  0xa6   :  { %1151 = vrcp.f32 %v257_v36  ;;  %v269_v45 = vand.u32 2147483648, %v257_v36  ;;  %v267_v47 = vand.u32 2147483647, %v257_v36  ;;  %vm263_vm2 = vweird.f32 %v257_v36 }
  0xa7   :  { %1153 = vtanh.f32 %v253_v42 }
  0xa8   :  { %v270_v50 = vor.u32 1.1754944e-38, %v269_v45  ;;  %vm268_vm4 = vcmp.eq.f32.partialorder %v267_v47, 8.507059e+37  ;;  %1155 = vpow2.f32 %v1109_v54 }
  0xac   :  { %v1152_v41 = vpop.eup %1151 }
  0xad   :  { %v259_v43 = vmul.f32 %v1152_v41, %v257_v36  ;;  %vm264_vm1 = vweird.f32 %v1152_v41  ;;  %v1154_v49 = vpop.eup %1153 }
  0xae   :  { %vm265_vm3 = vmor %vm263_vm2, %vm264_vm1  ;;  %v1156_v55 = vpop.eup %1155 }
  0xaf   :  { %v260_v44 = vsub.f32 1.0, %v259_v43  ;;  %v277_v56 = vadd.f32 1.0, %v1156_v55 }
  0xb1   :  { %v261_v46 = vmul.f32 %v1152_v41, %v260_v44  ;;  %1157 = vrcp.f32 %v277_v56  ;;  %vm283_vm5 = vweird.f32 %v277_v56  ;;  %v289_v5 = vand.u32 2147483648, %v277_v56 }
  0xb2   :  { %v287_v9 = vand.u32 2147483647, %v277_v56 }
  0xb3   :  { %v262_v48 = vadd.f32 %v1152_v41, %v261_v46  ;;  %v290_v12 = vor.u32 1.1754944e-38, %v289_v5 }
  0xb4   :  { %vm288_vm8 = vcmp.eq.f32.partialorder %v287_v9, 8.507059e+37  ;;  %v109_v27 = vpop.f32.mrf.mxu0  ;;  %v150_v36 = vpop.f32.mrf.mxu1 }
  0xb5   :  { %v266_v51 = vsel %vm265_vm3, %v1152_v41, %v262_v48  ;;  %v110_v29 = vadd.f32 %v109_v27, %v1503_v28  ;;  %v151_v38 = vadd.f32 %v150_v36, %v1508_v37 }
  0xb6   :  { %v271_v52 = vsel %vm268_vm4, %v270_v50, %v266_v51 }
  0xb7   :  { %v294_v53 = vmul.f32 %v1154_v49, %v271_v52  ;;  %v1158_v57 = vpop.eup %1157  ;;  %v293_v61 = vmul.f32 0.0, %v271_v52 }
  0xb8   :  { %v279_v58 = vmul.f32 %v1158_v57, %v277_v56  ;;  %vm284_vm6 = vweird.f32 %v1158_v57 }
  0xb9   :  { %296 = vrot.lane.b32.xlu0 %v294_v53, %s1279_s3  ;;  %vm285_vm7 = vmor %vm283_vm5, %vm284_vm6 }
  0xba   :  { %v280_v59 = vsub.f32 1.0, %v279_v58 }
  0xbc   :  { %v281_v60 = vmul.f32 %v1158_v57, %v280_v59 }
  0xbe   :  { %v282_v7 = vadd.f32 %v1158_v57, %v281_v60 }
  0xc0   :  { %v286_v15 = vsel %vm285_vm7, %v1158_v57, %v282_v7 }
  0xc1   :  { %v291_v22 = vsel %vm288_vm8, %v290_v12, %v286_v15 }
 0x12b   :  { %v297_v62 = vpop.permute.xlu0 %296 }
 0x12c   :  { %v1512_v63 = vadd.f32 %v297_v62, %v293_v61 }
 0x12e   :  { %1159 = vtanh.f32 %v1512_v63 }
 0x134   :  { %v1160_v19 = vpop.eup %1159 }
 0x135   :  { %v301_v24 = vmul.f32 %v1160_v19, %v291_v22 }
 0x137   :  { %308 = vrot.lane.b32.xlu0 %v301_v24, %s1279_s3 }
 0x1a9   :  { %v309_v26 = vpop.permute.xlu0 %308 }
 0x1aa   :  { %1110 = vmatmul.msk.f32.vlgmr.msrb.gmra.mxu2 %vm208_vm9, %v309_v26  ;;  %1111 = vmatmul.msk.f32.vlgmr.msrb.gmra.mxu3 %vm208_vm9, %v309_v26 }
 0x1ab   :  { %520 = vmatpush.msrb.mxu2 %v1331_v0  ;;  %540 = vmatpush.msrb.mxu3 %v1342_v2 }
 0x1ad   :  { %521 = vmatpush.msrb.mxu2 %v1336_v1  ;;  %541 = vmatpush.msrb.mxu3 %v1353_v4 }
 0x1af   :  { %522 = vmatpush.msrb.mxu2 %v1347_v3  ;;  %542 = vmatpush.msrb.mxu3 %v1359_v6 }
 0x1b1   :  { %523 = vmatpush.msrb.mxu2 %v1364_v8  ;;  %543 = vmatpush.msrb.mxu3 %v1371_v10 }
 0x1b3   :  { %524 = vmatpush.msrb.mxu2 %v1376_v11  ;;  %544 = vmatpush.msrb.mxu3 %v1383_v13 }
 0x1b5   :  { %525 = vmatpush.msrb.mxu2 %v1388_v14  ;;  %545 = vmatpush.msrb.mxu3 %v1398_v16 }
 0x1b7   :  { %526 = vmatpush.msrb.mxu2 %v1408_v18  ;;  %546 = vmatpush.msrb.mxu3 %v1416_v20 }
 0x1b9   :  { %527 = vmatpush.msrb.mxu2 %v1421_v21  ;;  %547 = vmatpush.msrb.mxu3 %v1430_v23 }
 0x22d   :  { %v329_v30 = vpop.f32.mrf.mxu2  ;;  %v349_v39 = vpop.f32.mrf.mxu3 }
 0x22e   :  { %v352_v31 = vadd.f32 %v329_v30, %v110_v29  ;;  %v353_v41 = vadd.f32 %v349_v39, %v151_v38 }
 0x230   :  { %v1112_v32 = vmul.f32 -1.442695, %v352_v31  ;;  %v1113_v53 = vmul.f32 -1.442695, %v353_v41 }
 0x232   :  { %1161 = vpow2.f32 %v1112_v32 }
 0x238   :  { %v1162_v34 = vpop.eup %1161 }
 0x239   :  { %v357_v35 = vadd.f32 1.0, %v1162_v34 }
 0x23b   :  { %1163 = vrcp.f32 %v357_v35  ;;  %v369_v44 = vand.u32 2147483648, %v357_v35  ;;  %v367_v46 = vand.u32 2147483647, %v357_v35  ;;  %vm363_vm11 = vweird.f32 %v357_v35 }
 0x23c   :  { %1165 = vtanh.f32 %v353_v41 }
 0x23d   :  { %v370_v48 = vor.u32 1.1754944e-38, %v369_v44  ;;  %vm368_vm13 = vcmp.eq.f32.partialorder %v367_v46, 8.507059e+37  ;;  %1167 = vpow2.f32 %v1113_v53 }
 0x241   :  { %v1164_v40 = vpop.eup %1163 }
 0x242   :  { %v359_v42 = vmul.f32 %v1164_v40, %v357_v35  ;;  %vm364_vm10 = vweird.f32 %v1164_v40  ;;  %v1166_v50 = vpop.eup %1165 }
 0x243   :  { %vm365_vm12 = vmor %vm363_vm11, %vm364_vm10  ;;  %v1168_v54 = vpop.eup %1167 }
 0x244   :  { %v360_v43 = vsub.f32 1.0, %v359_v42  ;;  %v377_v55 = vadd.f32 1.0, %v1168_v54 }
 0x246   :  { %v361_v45 = vmul.f32 %v1164_v40, %v360_v43  ;;  %1169 = vrcp.f32 %v377_v55  ;;  %v389_v7 = vand.u32 2147483648, %v377_v55  ;;  %vm383_vm15 = vweird.f32 %v377_v55 }
 0x247   :  { %v387_v9 = vand.u32 2147483647, %v377_v55 }
 0x248   :  { %v362_v47 = vadd.f32 %v1164_v40, %v361_v45  ;;  %v390_v15 = vor.u32 1.1754944e-38, %v389_v7 }
 0x249   :  { %vm388_vm2 = vcmp.eq.f32.partialorder %v387_v9, 8.507059e+37 }
 0x24a   :  { %v366_v49 = vsel %vm365_vm12, %v1164_v40, %v362_v47 }
 0x24b   :  { %v371_v51 = vsel %vm368_vm13, %v370_v48, %v366_v49 }
 0x24c   :  { %v394_v52 = vmul.f32 %v1166_v50, %v371_v51  ;;  %v1170_v56 = vpop.eup %1169  ;;  %v393_v60 = vmul.f32 %v371_v51, %v1512_v63  ;;  %v44_v63 = vld [vmem:[%s1714_s0 + $0x10] sm:$0xff] }
 0x24d   :  { %v379_v57 = vmul.f32 %v1170_v56, %v377_v55  ;;  %vm384_vm14 = vweird.f32 %v1170_v56  ;;  %1094 = vmatmul.msk.f32.gmra.mxu0 %vm64_vm0, %v44_v63  ;;  %1102 = vmatmul.msk.f32.gmra.mxu1 %vm64_vm0, %v44_v63 }
 0x24e   :  { %396 = vrot.lane.b32.xlu1 %v394_v52, %s1279_s3  ;;  %vm385_vm1 = vmor %vm383_vm15, %vm384_vm14 }
 0x24f   :  { %v380_v58 = vsub.f32 1.0, %v379_v57 }
 0x251   :  { %v381_v59 = vmul.f32 %v1170_v56, %v380_v58 }
 0x253   :  { %v382_v5 = vadd.f32 %v1170_v56, %v381_v59 }
 0x255   :  { %v386_v12 = vsel %vm385_vm1, %v1170_v56, %v382_v5 }
 0x256   :  { %v391_v22 = vsel %vm388_vm2, %v390_v15, %v386_v12 }
 0x2c0   :  { %v397_v61 = vpop.permute.xlu1 %396 }
 0x2c1   :  { %v1543_v62 = vadd.f32 %v397_v61, %v393_v60 }
 0x2c3   :  { %1171 = vtanh.f32 %v1543_v62 }
 0x2c9   :  { %v1172_v19 = vpop.eup %1171 }
 0x2ca   :  { %v401_v24 = vmul.f32 %v1172_v19, %v391_v22  ;;  %v112_v26 = vpop.f32.mrf.mxu0  ;;  %v153_v35 = vpop.f32.mrf.mxu1 }
 0x2cb   :  { %v113_v27 = vadd.f32 %v112_v26, %v1503_v28  ;;  %v154_v36 = vadd.f32 %v153_v35, %v1508_v37 }
 0x2cc   :  { %408 = vrot.lane.b32.xlu1 %v401_v24, %s1279_s3 }
 0x33e   :  { %v409_v25 = vpop.permute.xlu1 %408 }
 0x33f   :  { %1114 = vmatmul.msk.f32.vlgmr.msra.gmra.mxu2 %vm208_vm9, %v409_v25  ;;  %1115 = vmatmul.msk.f32.vlgmr.msra.gmra.mxu3 %vm208_vm9, %v409_v25 }
 0x340   :  { %720 = vmatpush.msra.mxu2 %v1331_v0  ;;  %740 = vmatpush.msra.mxu3 %v1342_v2 }
 0x342   :  { %721 = vmatpush.msra.mxu2 %v1336_v1  ;;  %741 = vmatpush.msra.mxu3 %v1353_v4 }
 0x344   :  { %722 = vmatpush.msra.mxu2 %v1347_v3  ;;  %742 = vmatpush.msra.mxu3 %v1359_v6 }
 0x346   :  { %723 = vmatpush.msra.mxu2 %v1364_v8  ;;  %743 = vmatpush.msra.mxu3 %v1371_v10 }
 0x348   :  { %724 = vmatpush.msra.mxu2 %v1376_v11  ;;  %744 = vmatpush.msra.mxu3 %v1383_v13 }
 0x34a   :  { %725 = vmatpush.msra.mxu2 %v1388_v14  ;;  %745 = vmatpush.msra.mxu3 %v1398_v16 }
 0x34c   :  { %726 = vmatpush.msra.mxu2 %v1408_v18  ;;  %746 = vmatpush.msra.mxu3 %v1416_v20 }
 0x34e   :  { %727 = vmatpush.msra.mxu2 %v1421_v21  ;;  %747 = vmatpush.msra.mxu3 %v1430_v23 }
 0x3c2   :  { %v429_v29 = vpop.f32.mrf.mxu2  ;;  %v449_v38 = vpop.f32.mrf.mxu3 }
 0x3c3   :  { %v452_v30 = vadd.f32 %v429_v29, %v113_v27  ;;  %v453_v40 = vadd.f32 %v449_v38, %v154_v36  ;;  %v46_v38 = vld [vmem:[%s1714_s0 + $0x20] sm:$0xff] }
 0x3c5   :  { %v1116_v31 = vmul.f32 -1.442695, %v452_v30  ;;  %v1117_v52 = vmul.f32 -1.442695, %v453_v40 }
 0x3c7   :  { %1173 = vpow2.f32 %v1116_v31 }
 0x3cd   :  { %v1174_v32 = vpop.eup %1173 }
 0x3ce   :  { %v457_v34 = vadd.f32 1.0, %v1174_v32 }
 0x3d0   :  { %1175 = vrcp.f32 %v457_v34  ;;  %v469_v43 = vand.u32 2147483648, %v457_v34  ;;  %v467_v45 = vand.u32 2147483647, %v457_v34  ;;  %vm463_vm4 = vweird.f32 %v457_v34 }
 0x3d1   :  { %1177 = vtanh.f32 %v453_v40 }
 0x3d2   :  { %v470_v47 = vor.u32 1.1754944e-38, %v469_v43  ;;  %vm468_vm6 = vcmp.eq.f32.partialorder %v467_v45, 8.507059e+37  ;;  %1179 = vpow2.f32 %v1117_v52  ;;  %v48_v43 = vld [vmem:[%s1714_s0 + $0x30] sm:$0xff] }
 0x3d6   :  { %v1176_v39 = vpop.eup %1175 }
 0x3d7   :  { %v459_v41 = vmul.f32 %v1176_v39, %v457_v34  ;;  %vm464_vm3 = vweird.f32 %v1176_v39  ;;  %v1178_v49 = vpop.eup %1177 }
 0x3d8   :  { %vm465_vm5 = vmor %vm463_vm4, %vm464_vm3  ;;  %v1180_v53 = vpop.eup %1179 }
 0x3d9   :  { %v460_v42 = vsub.f32 1.0, %v459_v41  ;;  %v477_v54 = vadd.f32 1.0, %v1180_v53 }
 0x3db   :  { %v461_v44 = vmul.f32 %v1176_v39, %v460_v42  ;;  %1181 = vrcp.f32 %v477_v54  ;;  %v489_v7 = vand.u32 2147483648, %v477_v54  ;;  %vm483_vm8 = vweird.f32 %v477_v54 }
 0x3dc   :  { %v487_v9 = vand.u32 2147483647, %v477_v54 }
 0x3dd   :  { %v462_v46 = vadd.f32 %v1176_v39, %v461_v44  ;;  %v490_v15 = vor.u32 1.1754944e-38, %v489_v7 }
 0x3de   :  { %vm488_vm11 = vcmp.eq.f32.partialorder %v487_v9, 8.507059e+37 }
 0x3df   :  { %v466_v48 = vsel %vm465_vm5, %v1176_v39, %v462_v46  ;;  %v47_v39 = vld [vmem:[%s1714_s0 + $0x28] sm:$0xff] }
 0x3e0   :  { %v471_v50 = vsel %vm468_vm6, %v470_v47, %v466_v48 }
 0x3e1   :  { %v494_v51 = vmul.f32 %v1178_v49, %v471_v50  ;;  %v1182_v55 = vpop.eup %1181  ;;  %v493_v59 = vmul.f32 %v471_v50, %v1543_v62  ;;  %v45_v62 = vld [vmem:[%s1714_s0 + $0x18] sm:$0xff] }
 0x3e2   :  { %v479_v56 = vmul.f32 %v1182_v55, %v477_v54  ;;  %vm484_vm7 = vweird.f32 %v1182_v55  ;;  %1095 = vmatmul.msk.f32.gmra.mxu0 %vm64_vm0, %v45_v62  ;;  %1103 = vmatmul.msk.f32.gmra.mxu1 %vm64_vm0, %v45_v62 }
 0x3e3   :  { %496 = vrot.lane.b32.xlu2 %v494_v51, %s1279_s3  ;;  %vm485_vm10 = vmor %vm483_vm8, %vm484_vm7 }
 0x3e4   :  { %v480_v57 = vsub.f32 1.0, %v479_v56 }
 0x3e6   :  { %v481_v58 = vmul.f32 %v1182_v55, %v480_v57 }
 0x3e8   :  { %v482_v5 = vadd.f32 %v1182_v55, %v481_v58 }
 0x3ea   :  { %v486_v12 = vsel %vm485_vm10, %v1182_v55, %v482_v5  ;;  %1104 = vmatmul.msk.f32.gmra.mxu1 %vm64_vm0, %v46_v38  ;;  %1096 = vmatmul.msk.f32.gmra.mxu0 %vm64_vm0, %v46_v38 }
 0x3eb   :  { %v491_v22 = vsel %vm488_vm11, %v490_v15, %v486_v12 }
 0x3f2   :  { %1105 = vmatmul.msk.f32.gmra.mxu1 %vm64_vm0, %v47_v39  ;;  %1097 = vmatmul.msk.f32.gmra.mxu0 %vm64_vm0, %v47_v39 }
 0x3fa   :  { %1106 = vmatmul.msk.f32.gmra.mxu1 %vm64_vm0, %v48_v43  ;;  %1098 = vmatmul.msk.f32.gmra.mxu0 %vm64_vm0, %v48_v43 }
 0x402   :  { %1107 = vmatmul.msk.f32.gmra.mxu1 %vm64_vm0, %v1403_v17 }
 0x43d   :  { %v497_v60 = vpop.permute.xlu2 %496 }
 0x43e   :  { %v1574_v61 = vadd.f32 %v497_v60, %v493_v59 }
 0x440   :  { %1183 = vtanh.f32 %v1574_v61 }
 0x446   :  { %v1184_v19 = vpop.eup %1183 }
 0x447   :  { %v501_v24 = vmul.f32 %v1184_v19, %v491_v22 }
 0x449   :  { %508 = vrot.lane.b32.xlu2 %v501_v24, %s1279_s3 }
 0x4a3   :  { %v509_v63 = vpop.permute.xlu2 %508 }
 0x4a4   :  { %1118 = vmatmul.msk.f32.vlgmr.msrb.gmra.mxu2 %vm208_vm9, %v509_v63  ;;  %1119 = vmatmul.msk.f32.vlgmr.msrb.gmra.mxu3 %vm208_vm9, %v509_v63 }
 0x4a5   :  { %920 = vmatpush.msrb.mxu2 %v1331_v0  ;;  %940 = vmatpush.msrb.mxu3 %v1342_v2  ;;  %v115_v0 = vpop.f32.mrf.mxu0 }
 0x4a7   :  { %921 = vmatpush.msrb.mxu2 %v1336_v1  ;;  %941 = vmatpush.msrb.mxu3 %v1353_v4  ;;  %v116_v1 = vadd.f32 %v115_v0, %v1503_v28 }
 0x4a9   :  { %922 = vmatpush.msrb.mxu2 %v1347_v3  ;;  %942 = vmatpush.msrb.mxu3 %v1359_v6 }
 0x4ab   :  { %923 = vmatpush.msrb.mxu2 %v1364_v8  ;;  %943 = vmatpush.msrb.mxu3 %v1371_v10  ;;  %v156_v10 = vpop.f32.mrf.mxu1 }
 0x4ad   :  { %924 = vmatpush.msrb.mxu2 %v1376_v11  ;;  %944 = vmatpush.msrb.mxu3 %v1383_v13  ;;  %v157_v11 = vadd.f32 %v156_v10, %v1508_v37  ;;  %v118_v57 = vpop.f32.mrf.mxu0 }
 0x4ae   :  { %v119_v5 = vadd.f32 %v118_v57, %v1503_v28 }
 0x4af   :  { %925 = vmatpush.msrb.mxu2 %v1388_v14  ;;  %945 = vmatpush.msrb.mxu3 %v1398_v16 }
 0x4b1   :  { %926 = vmatpush.msrb.mxu2 %v1408_v18  ;;  %946 = vmatpush.msrb.mxu3 %v1416_v20 }
 0x4b3   :  { %927 = vmatpush.msrb.mxu2 %v1421_v21  ;;  %947 = vmatpush.msrb.mxu3 %v1430_v23  ;;  %v159_v58 = vpop.f32.mrf.mxu1 }
 0x4b4   :  { %v160_v62 = vadd.f32 %v159_v58, %v1508_v37 }
 0x4b5   :  { %v1628_v59 = vpop.f32.mrf.mxu0 }
 0x4b6   :  { %v122_v43 = vadd.f32 %v1628_v59, %v1503_v28 }
 0x4bb   :  { %v1630_v60 = vpop.f32.mrf.mxu1 }
 0x4bd   :  { %v1632_v17 = vpop.f32.mrf.mxu0 }
 0x527   :  { %v529_v2 = vpop.f32.mrf.mxu2  ;;  %v549_v13 = vpop.f32.mrf.mxu3 }
 0x528   :  { %v552_v3 = vadd.f32 %v529_v2, %v116_v1  ;;  %v553_v16 = vadd.f32 %v549_v13, %v157_v11 }
 0x52a   :  { %v1120_v4 = vmul.f32 -1.442695, %v552_v3  ;;  %v1121_v34 = vmul.f32 -1.442695, %v553_v16 }
 0x52c   :  { %1185 = vpow2.f32 %v1120_v4 }
 0x532   :  { %v1186_v6 = vpop.eup %1185 }
 0x533   :  { %v557_v8 = vadd.f32 1.0, %v1186_v6 }
 0x535   :  { %1187 = vrcp.f32 %v557_v8  ;;  %v569_v21 = vand.u32 2147483648, %v557_v8  ;;  %v567_v25 = vand.u32 2147483647, %v557_v8  ;;  %vm563_vm13 = vweird.f32 %v557_v8 }
 0x536   :  { %1189 = vtanh.f32 %v553_v16 }
 0x537   :  { %v570_v27 = vor.u32 1.1754944e-38, %v569_v21  ;;  %vm568_vm15 = vcmp.eq.f32.partialorder %v567_v25, 8.507059e+37  ;;  %1191 = vpow2.f32 %v1121_v34 }
 0x53b   :  { %v1188_v14 = vpop.eup %1187 }
 0x53c   :  { %v559_v18 = vmul.f32 %v1188_v14, %v557_v8  ;;  %vm564_vm12 = vweird.f32 %v1188_v14  ;;  %v1190_v30 = vpop.eup %1189 }
 0x53d   :  { %vm565_vm14 = vmor %vm563_vm13, %vm564_vm12  ;;  %v1192_v35 = vpop.eup %1191 }
 0x53e   :  { %v560_v20 = vsub.f32 1.0, %v559_v18  ;;  %v577_v36 = vadd.f32 1.0, %v1192_v35 }
 0x540   :  { %v561_v23 = vmul.f32 %v1188_v14, %v560_v20  ;;  %1193 = vrcp.f32 %v577_v36  ;;  %v589_v49 = vand.u32 2147483648, %v577_v36  ;;  %vm583_vm2 = vweird.f32 %v577_v36 }
 0x541   :  { %v587_v50 = vand.u32 2147483647, %v577_v36 }
 0x542   :  { %v562_v26 = vadd.f32 %v1188_v14, %v561_v23  ;;  %v590_v52 = vor.u32 1.1754944e-38, %v589_v49 }
 0x543   :  { %vm588_vm4 = vcmp.eq.f32.partialorder %v587_v50, 8.507059e+37  ;;  %v163_v50 = vadd.f32 %v1630_v60, %v1508_v37 }
 0x544   :  { %v566_v29 = vsel %vm565_vm14, %v1188_v14, %v562_v26 }
 0x545   :  { %v571_v31 = vsel %vm568_vm15, %v570_v27, %v566_v29 }
 0x546   :  { %v594_v32 = vmul.f32 %v1190_v30, %v571_v31  ;;  %v1194_v40 = vpop.eup %1193  ;;  %v593_v45 = vmul.f32 %v571_v31, %v1574_v61  ;;  %v1634_v61 = vpop.f32.mrf.mxu1 }
 0x547   :  { %v579_v41 = vmul.f32 %v1194_v40, %v577_v36  ;;  %vm584_vm1 = vweird.f32 %v1194_v40 }
 0x548   :  { %596 = vrot.lane.b32.xlu0 %v594_v32, %s1279_s3  ;;  %vm585_vm3 = vmor %vm583_vm2, %vm584_vm1 }
 0x549   :  { %v580_v42 = vsub.f32 1.0, %v579_v41 }
 0x54b   :  { %v581_v44 = vmul.f32 %v1194_v40, %v580_v42 }
 0x54d   :  { %v582_v48 = vadd.f32 %v1194_v40, %v581_v44 }
 0x54e   :  { %v1637_v15 = vpop.f32.mrf.mxu1 }
 0x54f   :  { %v586_v51 = vsel %vm585_vm3, %v1194_v40, %v582_v48 }
 0x550   :  { %v591_v54 = vsel %vm588_vm4, %v590_v52, %v586_v51 }
 0x5ba   :  { %v597_v46 = vpop.permute.xlu0 %596 }
 0x5bb   :  { %v1620_v47 = vadd.f32 %v597_v46, %v593_v45 }
 0x5bd   :  { %1195 = vtanh.f32 %v1620_v47 }
 0x5c3   :  { %v1196_v53 = vpop.eup %1195 }
 0x5c4   :  { %v601_v55 = vmul.f32 %v1196_v53, %v591_v54 }
 0x5c6   :  { %608 = vrot.lane.b32.xlu1 %v601_v55, %s1279_s3 }
 0x638   :  { %v609_v56 = vpop.permute.xlu1 %608 }
 0x639   :  { %1122 = vmatmul.msk.f32.vlgmr.msrb.gmra.mxu0 %vm208_vm9, %v609_v56  ;;  %1123 = vmatmul.msk.f32.vlgmr.msra.gmra.mxu1 %vm208_vm9, %v609_v56 }
 0x6b6   :  { %v629_v7 = vpop.f32.mrf.mxu0  ;;  %v649_v24 = vpop.f32.mrf.mxu1 }
 0x6b7   :  { %v652_v9 = vadd.f32 %v629_v7, %v119_v5  ;;  %v653_v0 = vadd.f32 %v649_v24, %v160_v62 }
 0x6b9   :  { %v1124_v12 = vmul.f32 -1.442695, %v652_v9  ;;  %v1125_v18 = vmul.f32 -1.442695, %v653_v0 }
 0x6bb   :  { %1197 = vpow2.f32 %v1124_v12 }
 0x6c1   :  { %v1198_v19 = vpop.eup %1197 }
 0x6c2   :  { %v657_v22 = vadd.f32 1.0, %v1198_v19 }
 0x6c4   :  { %1199 = vrcp.f32 %v657_v22  ;;  %v669_v3 = vand.u32 2147483648, %v657_v22  ;;  %v667_v6 = vand.u32 2147483647, %v657_v22  ;;  %vm663_vm5 = vweird.f32 %v657_v22 }
 0x6c5   :  { %1201 = vtanh.f32 %v653_v0 }
 0x6c6   :  { %v670_v10 = vor.u32 1.1754944e-38, %v669_v3  ;;  %vm668_vm7 = vcmp.eq.f32.partialorder %v667_v6, 8.507059e+37  ;;  %1203 = vpow2.f32 %v1125_v18 }
 0x6ca   :  { %v1200_v63 = vpop.eup %1199 }
 0x6cb   :  { %v659_v1 = vmul.f32 %v1200_v63, %v657_v22  ;;  %vm664_vm0 = vweird.f32 %v1200_v63  ;;  %v1202_v13 = vpop.eup %1201 }
 0x6cc   :  { %vm665_vm6 = vmor %vm663_vm5, %vm664_vm0  ;;  %v1204_v20 = vpop.eup %1203 }
 0x6cd   :  { %v660_v2 = vsub.f32 1.0, %v659_v1  ;;  %v677_v21 = vadd.f32 1.0, %v1204_v20  ;;  %v125_v20 = vadd.f32 %v1632_v17, %v1503_v28 }
 0x6cf   :  { %v661_v4 = vmul.f32 %v1200_v63, %v660_v2  ;;  %1205 = vrcp.f32 %v677_v21  ;;  %v689_v34 = vand.u32 2147483648, %v677_v21  ;;  %vm683_vm10 = vweird.f32 %v677_v21 }
 0x6d0   :  { %v687_v35 = vand.u32 2147483647, %v677_v21 }
 0x6d1   :  { %v662_v8 = vadd.f32 %v1200_v63, %v661_v4  ;;  %v690_v38 = vor.u32 1.1754944e-38, %v689_v34 }
 0x6d2   :  { %vm688_vm12 = vcmp.eq.f32.partialorder %v687_v35, 8.507059e+37 }
 0x6d3   :  { %v666_v11 = vsel %vm665_vm6, %v1200_v63, %v662_v8 }
 0x6d4   :  { %v671_v14 = vsel %vm668_vm7, %v670_v10, %v666_v11 }
 0x6d5   :  { %v694_v16 = vmul.f32 %v1202_v13, %v671_v14  ;;  %v1206_v23 = vpop.eup %1205  ;;  %v693_v29 = vmul.f32 %v671_v14, %v1620_v47 }
 0x6d6   :  { %v679_v25 = vmul.f32 %v1206_v23, %v677_v21  ;;  %vm684_vm8 = vweird.f32 %v1206_v23 }
 0x6d7   :  { %696 = vrot.lane.b32.xlu2 %v694_v16, %s1279_s3  ;;  %vm685_vm11 = vmor %vm683_vm10, %vm684_vm8 }
 0x6d8   :  { %v680_v26 = vsub.f32 1.0, %v679_v25 }
 0x6da   :  { %v681_v27 = vmul.f32 %v1206_v23, %v680_v26 }
 0x6dc   :  { %v682_v32 = vadd.f32 %v1206_v23, %v681_v27 }
 0x6de   :  { %v686_v36 = vsel %vm685_vm11, %v1206_v23, %v682_v32 }
 0x6df   :  { %v691_v40 = vsel %vm688_vm12, %v690_v38, %v686_v36 }
 0x731   :  { %v697_v30 = vpop.permute.xlu2 %696 }
 0x732   :  { %v699_v31 = vadd.f32 %v697_v30, %v693_v29  ;;  %v166_v30 = vadd.f32 %v1634_v61, %v1508_v37 }
 0x734   :  { %1207 = vtanh.f32 %v699_v31 }
 0x73a   :  { %v1208_v39 = vpop.eup %1207 }
 0x73b   :  { %v701_v41 = vmul.f32 %v1208_v39, %v691_v40 }
 0x73d   :  { %708 = vrot.lane.b32.xlu0 %v701_v41, %s1279_s3 }
 0x7af   :  { %v709_v42 = vpop.permute.xlu0 %708 }
 0x7b0   :  { %1126 = vmatmul.msk.f32.vlgmr.msra.gmra.mxu2 %vm208_vm9, %v709_v42  ;;  %1127 = vmatmul.msk.f32.vlgmr.msra.gmra.mxu3 %vm208_vm9, %v709_v42 }
 0x833   :  { %v729_v44 = vpop.f32.mrf.mxu2  ;;  %v749_v49 = vpop.f32.mrf.mxu3 }
 0x834   :  { %v752_v45 = vadd.f32 %v729_v44, %v122_v43  ;;  %v753_v52 = vadd.f32 %v749_v49, %v163_v50 }
 0x836   :  { %v1128_v46 = vmul.f32 -1.442695, %v752_v45  ;;  %v1129_v60 = vmul.f32 -1.442695, %v753_v52 }
 0x838   :  { %1209 = vpow2.f32 %v1128_v46 }
 0x83e   :  { %v1210_v47 = vpop.eup %1209 }
 0x83f   :  { %v757_v48 = vadd.f32 1.0, %v1210_v47 }
 0x841   :  { %1211 = vrcp.f32 %v757_v48  ;;  %v769_v55 = vand.u32 2147483648, %v757_v48  ;;  %v767_v57 = vand.u32 2147483647, %v757_v48  ;;  %vm763_vm14 = vweird.f32 %v757_v48 }
 0x842   :  { %1213 = vtanh.f32 %v753_v52 }
 0x843   :  { %v770_v59 = vor.u32 1.1754944e-38, %v769_v55  ;;  %vm768_vm1 = vcmp.eq.f32.partialorder %v767_v57, 8.507059e+37  ;;  %1215 = vpow2.f32 %v1129_v60 }
 0x847   :  { %v1212_v51 = vpop.eup %1211 }
 0x848   :  { %v759_v53 = vmul.f32 %v1212_v51, %v757_v48  ;;  %vm764_vm13 = vweird.f32 %v1212_v51  ;;  %v1214_v7 = vpop.eup %1213 }
 0x849   :  { %vm765_vm15 = vmor %vm763_vm14, %vm764_vm13  ;;  %v1216_v19 = vpop.eup %1215 }
 0x84a   :  { %v760_v54 = vsub.f32 1.0, %v759_v53  ;;  %v777_v22 = vadd.f32 1.0, %v1216_v19 }
 0x84c   :  { %v761_v56 = vmul.f32 %v1212_v51, %v760_v54  ;;  %1217 = vrcp.f32 %v777_v22  ;;  %v789_v6 = vand.u32 2147483648, %v777_v22  ;;  %vm783_vm3 = vweird.f32 %v777_v22 }
 0x84d   :  { %v787_v8 = vand.u32 2147483647, %v777_v22 }
 0x84e   :  { %v762_v58 = vadd.f32 %v1212_v51, %v761_v56  ;;  %v790_v11 = vor.u32 1.1754944e-38, %v789_v6 }
 0x84f   :  { %vm788_vm0 = vcmp.eq.f32.partialorder %v787_v8, 8.507059e+37 }
 0x850   :  { %v766_v5 = vsel %vm765_vm15, %v1212_v51, %v762_v58 }
 0x851   :  { %v771_v9 = vsel %vm768_vm1, %v770_v59, %v766_v5 }
 0x852   :  { %v794_v12 = vmul.f32 %v1214_v7, %v771_v9  ;;  %v1218_v24 = vpop.eup %1217  ;;  %v793_v1 = vmul.f32 %v771_v9, %v699_v31 }
 0x853   :  { %v779_v62 = vmul.f32 %v1218_v24, %v777_v22  ;;  %vm784_vm2 = vweird.f32 %v1218_v24 }
 0x854   :  { %796 = vrot.lane.b32.xlu1 %v794_v12, %s1279_s3  ;;  %vm785_vm4 = vmor %vm783_vm3, %vm784_vm2  ;;  %v128_v12 = vadd.f32 %v1506_v33, %v1503_v28 }
 0x855   :  { %v780_v63 = vsub.f32 1.0, %v779_v62 }
 0x857   :  { %v781_v0 = vmul.f32 %v1218_v24, %v780_v63 }
 0x859   :  { %v782_v4 = vadd.f32 %v1218_v24, %v781_v0  ;;  %v169_v0 = vadd.f32 %v1637_v15, %v1508_v37 }
 0x85b   :  { %v786_v10 = vsel %vm785_vm4, %v1218_v24, %v782_v4 }
 0x85c   :  { %v791_v14 = vsel %vm788_vm0, %v790_v11, %v786_v10 }
 0x8c6   :  { %v797_v2 = vpop.permute.xlu1 %796 }
 0x8c7   :  { %v799_v3 = vadd.f32 %v797_v2, %v793_v1 }
 0x8c9   :  { %1219 = vtanh.f32 %v799_v3 }
 0x8cf   :  { %v1220_v13 = vpop.eup %1219 }
 0x8d0   :  { %v801_v16 = vmul.f32 %v1220_v13, %v791_v14 }
 0x8d2   :  { %808 = vrot.lane.b32.xlu2 %v801_v16, %s1279_s3 }
 0x92c   :  { %v809_v18 = vpop.permute.xlu2 %808 }
 0x92d   :  { %1130 = vmatmul.msk.f32.vlgmr.msra.gmra.mxu0 %vm208_vm9, %v809_v18  ;;  %1131 = vmatmul.msk.f32.vlgmr.msrb.gmra.mxu1 %vm208_vm9, %v809_v18 }
 0x9aa   :  { %v829_v21 = vpop.f32.mrf.mxu0  ;;  %v849_v29 = vpop.f32.mrf.mxu1 }
 0x9ab   :  { %v852_v23 = vadd.f32 %v829_v21, %v125_v20  ;;  %v853_v32 = vadd.f32 %v849_v29, %v166_v30  ;;  %v1009_v21 = vld [vmem:[%s1718_s4 + $0x38] sm:$0xff] }
 0x9ac   :  { %1027 = vmatpush.msrb.mxu0 %v1009_v21  ;;  %v1005_v30 = vld [vmem:[%s1718_s4 + $0x18] sm:$0xff] }
 0x9ad   :  { %v1132_v25 = vmul.f32 -1.442695, %v852_v23  ;;  %v1133_v61 = vmul.f32 -1.442695, %v853_v32  ;;  %v1008_v23 = vld [vmem:[%s1718_s4 + $0x30] sm:$0xff] }
 0x9ae   :  { %1028 = vmatpush.msrb.mxu0 %v1008_v23 }
 0x9af   :  { %1221 = vpow2.f32 %v1132_v25 }
 0x9b5   :  { %v1222_v26 = vpop.eup %1221 }
 0x9b6   :  { %v857_v27 = vadd.f32 1.0, %v1222_v26  ;;  %v1007_v26 = vld [vmem:[%s1718_s4 + $0x28] sm:$0xff] }
 0x9b7   :  { %1029 = vmatpush.msrb.mxu0 %v1007_v26 }
 0x9b8   :  { %1223 = vrcp.f32 %v857_v27  ;;  %v869_v36 = vand.u32 2147483648, %v857_v27  ;;  %v867_v17 = vand.u32 2147483647, %v857_v27  ;;  %vm863_vm6 = vweird.f32 %v857_v27 }
 0x9b9   :  { %1225 = vtanh.f32 %v853_v32 }
 0x9ba   :  { %v870_v40 = vor.u32 1.1754944e-38, %v869_v36  ;;  %vm868_vm8 = vcmp.eq.f32.partialorder %v867_v17, 8.507059e+37  ;;  %1227 = vpow2.f32 %v1133_v61 }
 0x9be   :  { %v1224_v31 = vpop.eup %1223 }
 0x9bf   :  { %v859_v34 = vmul.f32 %v1224_v31, %v857_v27  ;;  %vm864_vm5 = vweird.f32 %v1224_v31  ;;  %v1226_v42 = vpop.eup %1225  ;;  %v1006_v27 = vld [vmem:[%s1718_s4 + $0x20] sm:$0xff] }
 0x9c0   :  { %vm865_vm7 = vmor %vm863_vm6, %vm864_vm5  ;;  %v1228_v45 = vpop.eup %1227  ;;  %1030 = vmatpush.msrb.mxu0 %v1006_v27  ;;  %vm1039_vm6 = vcmask 23552  }
 0x9c1   :  { %v860_v35 = vsub.f32 1.0, %v859_v34  ;;  %v877_v46 = vadd.f32 1.0, %v1228_v45  ;;  %v1003_v34 = vld [vmem:[%s1718_s4 + $0x8] sm:$0xff] }
 0x9c2   :  { %1031 = vmatpush.msrb.mxu0 %v1005_v30 }
 0x9c3   :  { %v861_v38 = vmul.f32 %v1224_v31, %v860_v35  ;;  %1229 = vrcp.f32 %v877_v46  ;;  %v889_v55 = vand.u32 2147483648, %v877_v46  ;;  %vm883_vm11 = vweird.f32 %v877_v46 }
 0x9c4   :  { %v887_v56 = vand.u32 2147483647, %v877_v46 }
 0x9c5   :  { %v862_v39 = vadd.f32 %v1224_v31, %v861_v38  ;;  %v890_v58 = vor.u32 1.1754944e-38, %v889_v55  ;;  %v1002_v38 = vld [vmem:[%s1718_s4] sm:$0xff] }
 0x9c6   :  { %vm888_vm13 = vcmp.eq.f32.partialorder %v887_v56, 8.507059e+37 }
 0x9c7   :  { %v866_v41 = vsel %vm865_vm7, %v1224_v31, %v862_v39  ;;  %v1004_v31 = vld [vmem:[%s1718_s4 + $0x10] sm:$0xff] }
 0x9c8   :  { %v871_v43 = vsel %vm868_vm8, %v870_v40, %v866_v41  ;;  %1032 = vmatpush.msrb.mxu0 %v1004_v31 }
 0x9c9   :  { %v894_v44 = vmul.f32 %v1226_v42, %v871_v43  ;;  %v1230_v47 = vpop.eup %1229  ;;  %v893_v51 = vmul.f32 %v871_v43, %v799_v3 }
 0x9ca   :  { %v879_v48 = vmul.f32 %v1230_v47, %v877_v46  ;;  %vm884_vm10 = vweird.f32 %v1230_v47  ;;  %1033 = vmatpush.msrb.mxu0 %v1003_v34 }
 0x9cb   :  { %896 = vrot.lane.b32.xlu0 %v894_v44, %s1279_s3  ;;  %vm885_vm12 = vmor %vm883_vm11, %vm884_vm10 }
 0x9cc   :  { %v880_v49 = vsub.f32 1.0, %v879_v48  ;;  %1034 = vmatpush.msrb.mxu0 %v1002_v38  ;;  %v1148_v48 = vld [vmem:[%s1719_s5] ss:$0 sm:$0xff] }
 0x9ce   :  { %v881_v50 = vmul.f32 %v1230_v47, %v880_v49 }
 0x9d0   :  { %v882_v54 = vadd.f32 %v1230_v47, %v881_v50 }
 0x9d2   :  { %v886_v57 = vsel %vm885_vm12, %v1230_v47, %v882_v54 }
 0x9d3   :  { %v891_v5 = vsel %vm888_vm13, %v890_v58, %v886_v57 }
 0xa3d   :  { %v897_v52 = vpop.permute.xlu0 %896 }
 0xa3e   :  { %v1658_v53 = vadd.f32 %v897_v52, %v893_v51 }
 0xa40   :  { %1231 = vtanh.f32 %v1658_v53 }
 0xa46   :  { %v1232_v59 = vpop.eup %1231 }
 0xa47   :  { %v901_v7 = vmul.f32 %v1232_v59, %v891_v5 }
 0xa49   :  { %908 = vrot.lane.b32.xlu1 %v901_v7, %s1279_s3 }
 0xabb   :  { %v909_v9 = vpop.permute.xlu1 %908 }
 0xabc   :  { %1134 = vmatmul.msk.f32.vlgmr.msrb.gmra.mxu2 %vm208_vm9, %v909_v9  ;;  %1135 = vmatmul.msk.f32.vlgmr.msrb.gmra.mxu3 %vm208_vm9, %v909_v9 }
 0xb3f   :  { %v929_v60 = vpop.f32.mrf.mxu2  ;;  %v949_v63 = vpop.f32.mrf.mxu3 }
 0xb40   :  { %v952_v19 = vadd.f32 %v929_v60, %v128_v12  ;;  %v953_v2 = vadd.f32 %v949_v63, %v169_v0 }
 0xb42   :  { %v1136_v22 = vmul.f32 -1.442695, %v952_v19  ;;  %v1137_v37 = vmul.f32 -1.442695, %v953_v2 }
 0xb44   :  { %1233 = vpow2.f32 %v1136_v22 }
 0xb4a   :  { %v1234_v24 = vpop.eup %1233 }
 0xb4b   :  { %v957_v62 = vadd.f32 1.0, %v1234_v24 }
 0xb4d   :  { %1235 = vrcp.f32 %v957_v62  ;;  %v969_v6 = vand.u32 2147483648, %v957_v62  ;;  %v967_v28 = vand.u32 2147483647, %v957_v62  ;;  %vm963_vm15 = vweird.f32 %v957_v62 }
 0xb4e   :  { %1237 = vtanh.f32 %v953_v2 }
 0xb4f   :  { %v970_v10 = vor.u32 1.1754944e-38, %v969_v6  ;;  %vm968_vm2 = vcmp.eq.f32.partialorder %v967_v28, 8.507059e+37  ;;  %1239 = vpow2.f32 %v1137_v37 }
 0xb53   :  { %v1236_v1 = vpop.eup %1235 }
 0xb54   :  { %v959_v3 = vmul.f32 %v1236_v1, %v957_v62  ;;  %vm964_vm14 = vweird.f32 %v1236_v1  ;;  %v1238_v13 = vpop.eup %1237 }
 0xb55   :  { %vm965_vm1 = vmor %vm963_vm15, %vm964_vm14  ;;  %v1240_v15 = vpop.eup %1239 }
 0xb56   :  { %v960_v4 = vsub.f32 1.0, %v959_v3  ;;  %v977_v18 = vadd.f32 1.0, %v1240_v15 }
 0xb58   :  { %v961_v8 = vmul.f32 %v1236_v1, %v960_v4  ;;  %1241 = vrcp.f32 %v977_v18  ;;  %v989_v40 = vand.u32 2147483648, %v977_v18  ;;  %vm983_vm4 = vweird.f32 %v977_v18 }
 0xb59   :  { %v987_v41 = vand.u32 2147483647, %v977_v18 }
 0xb5a   :  { %v962_v33 = vadd.f32 %v1236_v1, %v961_v8  ;;  %v990_v43 = vor.u32 1.1754944e-38, %v989_v40 }
 0xb5b   :  { %vm988_vm5 = vcmp.eq.f32.partialorder %v987_v41, 8.507059e+37 }
 0xb5c   :  { %v966_v11 = vsel %vm965_vm1, %v1236_v1, %v962_v33 }
 0xb5d   :  { %v971_v14 = vsel %vm968_vm2, %v970_v10, %v966_v11 }
 0xb5e   :  { %v994_v16 = vmul.f32 %v1238_v13, %v971_v14  ;;  %v1242_v20 = vpop.eup %1241  ;;  %v993_v35 = vmul.f32 %v971_v14, %v1658_v53 }
 0xb5f   :  { %v979_v25 = vmul.f32 %v1242_v20, %v977_v18  ;;  %vm984_vm3 = vweird.f32 %v1242_v20 }
 0xb60   :  { %996 = vrot.lane.b32.xlu2 %v994_v16, %s1279_s3  ;;  %vm985_vm0 = vmor %vm983_vm4, %vm984_vm3 }
 0xb61   :  { %v980_v29 = vsub.f32 1.0, %v979_v25 }
 0xb63   :  { %v981_v32 = vmul.f32 %v1242_v20, %v980_v29 }
 0xb65   :  { %v982_v39 = vadd.f32 %v1242_v20, %v981_v32 }
 0xb67   :  { %v986_v42 = vsel %vm985_vm0, %v1242_v20, %v982_v39 }
 0xb68   :  { %v991_v61 = vsel %vm988_vm5, %v990_v43, %v986_v42 }
 0xbba   :  { %v997_v36 = vpop.permute.xlu2 %996 }
 0xbbb   :  { %v999_v17 = vadd.f32 %v997_v36, %v993_v35 }
 0xbbd   :  { %1243 = vtanh.f32 %v999_v17 }
 0xbc3   :  { %v1244_v44 = vpop.eup %1243 }
 0xbc4   :  { %v1001_v45 = vmul.f32 %v1244_v44, %v991_v61 }
 0xbc6   :  { %1015 = vrot.lane.b32.xlu0 %v1001_v45, %s1279_s3 }
 0xbce   :  { %1068 = vrot.lane.b32.xlu0 %v999_v17, %s1279_s3 }
 0xc38   :  { %v1016_v46 = vpop.permute.xlu0 %1015 }
 0xc39   :  { %1066 = vst.msk [vmem:[%s1721_s7] sm:$0xff] %vm208_vm9, %v1016_v46  ;;  %1138 = vmatmul.msk.f32.vlgmr.msrb.gmra.mxu0 %vm208_vm9, %v1016_v46 }
 0xc40   :  { %v1069_v47 = vpop.permute.xlu0 %1068 }
 0xc41   :  { %1071 = vst.msk [vmem:[%s1722_s8] sm:$0xff] %vm208_vm9, %v1069_v47 }
 0xcb6   :  { %v1036_v49 = vpop.f32.mrf.mxu0 }
 0xcb7   :  { %v1037_v50 = vadd.f32 %v1148_v48, %v1036_v49 }
 0xcb9   :  { %v1040_v51 = vsel %vm1039_vm6, %v1037_v50, -inf }
 0xcba   :  { %1041 = vmax.xlane.f32.xlu1 %v1040_v51 }
 0xd2d   :  { %v1042_v52 = vpop.xlane.xlu1 %1041 }
 0xd2e   :  { %v1043_v53 = vsub.f32 %v1037_v50, %v1042_v52 }
 0xd30   :  { %v1044_v54 = vmul.f32 1.442695, %v1043_v53 }
 0xd32   :  { %1245 = vpow2.f32 %v1044_v54 }
 0xd38   :  { %v1246_v55 = vpop.eup %1245 }
 0xd39   :  { %v1046_v56 = vsel %vm1039_vm6, %v1246_v55, 0.0 }
 0xd3a   :  { %1047 = vadd.xlane.f32.xlu2 %v1046_v56 }
 0xdad   :  { %v1048_v57 = vpop.xlane.xlu2 %1047 }
 0xdae   :  { %1247 = vrcp.f32 %v1048_v57  ;;  %v1060_v7 = vand.u32 2147483648, %v1048_v57  ;;  %v1058_v12 = vand.u32 2147483647, %v1048_v57  ;;  %vm1054_vm7 = vweird.f32 %v1048_v57 }
 0xdb0   :  { %v1061_v19 = vor.u32 1.1754944e-38, %v1060_v7  ;;  %vm1059_vm10 = vcmp.eq.f32.partialorder %v1058_v12, 8.507059e+37 }
 0xdb4   :  { %v1248_v58 = vpop.eup %1247 }
 0xdb5   :  { %v1050_v59 = vmul.f32 %v1248_v58, %v1048_v57  ;;  %vm1055_vm9 = vweird.f32 %v1248_v58 }
 0xdb6   :  { %vm1056_vm8 = vmor %vm1054_vm7, %vm1055_vm9 }
 0xdb7   :  { %v1051_v5 = vsub.f32 1.0, %v1050_v59 }
 0xdb9   :  { %v1052_v9 = vmul.f32 %v1248_v58, %v1051_v5 }
 0xdbb   :  { %v1053_v60 = vadd.f32 %v1248_v58, %v1052_v9 }
 0xdbd   :  { %v1057_v22 = vsel %vm1056_vm8, %v1248_v58, %v1053_v60 }
 0xdbe   :  { %v1062_v24 = vsel %vm1059_vm10, %v1061_v19, %v1057_v22 }
 0xdbf   :  { %v1063_v62 = vmul.f32 %v1246_v55, %v1062_v24 }
 0xdc1   :  { %1064 = vst.msk [vmem:[%s1720_s6] sm:$0xff] %vm1039_vm6, %v1063_v62 }
 0xdc2   :  { %1084 = vsyncpa [#allocation4], 1 }

</bundles_post_ra>
